<compile_context>
chip_gen: v5e
topology: v5e:2x2
jax: 0.10.0
libtpu: 0.0.40
codegen_flags: <defaults>
</compile_context>

<pallas_src>
from math import sqrt

import jax
import jax.numpy as jnp
from jax import lax
from jax.experimental import pallas as pl
from jax.experimental.pallas import tpu as pltpu

D_MODEL = 64
N_HEADS = 8
D_HEAD = D_MODEL // N_HEADS
D_FF = 4 * D_MODEL
LN_EPS = 1e-5

# On v6e/v7x, jnp.bfloat16 here ~doubles MXU throughput (accumulation stays f32 via
# preferred_element_type).  Kept f32 to preserve the tight 2e-3 tolerance everywhere.
MATMUL_DTYPE = jnp.float32


def _layernorm(x, gamma, beta):
    mu = jnp.mean(x, axis=-1, keepdims=True)
    var = jnp.mean((x - mu) ** 2, axis=-1, keepdims=True)
    return (x - mu) * lax.rsqrt(var + LN_EPS) * gamma + beta


def _make_kernel(b_tile, seq):
    rows = b_tile * seq

    def kernel(
        x_ref,
        wq_ref, bq_ref, wk_ref, bk_ref, wv_ref, bv_ref, wo_ref, bo_ref,
        w1_ref, b1_ref, w2_ref, b2_ref,
        g1_ref, be1_ref, g2_ref, be2_ref,
        o_ref,
    ):
        d = x_ref.shape[-1]
        xf = x_ref[...]                                  # (rows, D_MODEL)

        def cast(a):
            return a.astype(MATMUL_DTYPE)

        # --- QKV projections (nn.Linear; weights pre-transposed in the wrapper) ---
        q = jnp.dot(cast(xf), cast(wq_ref[...]), preferred_element_type=jnp.float32) + bq_ref[...]
        k = jnp.dot(cast(xf), cast(wk_ref[...]), preferred_element_type=jnp.float32) + bk_ref[...]
        v = jnp.dot(cast(xf), cast(wv_ref[...]), preferred_element_type=jnp.float32) + bv_ref[...]

        # Fold the softmax scale into Q once.
        q = q * (1.0 / sqrt(D_HEAD))

        q3 = q.reshape(b_tile, seq, d)
        k3 = k.reshape(b_tile, seq, d)
        v3 = v.reshape(b_tile, seq, d)

        # Causal mask (keep j <= i), built once per grid step.
        rows_i = lax.broadcasted_iota(jnp.int32, (b_tile, seq, seq), 1)
        cols_i = lax.broadcasted_iota(jnp.int32, (b_tile, seq, seq), 2)
        keep = cols_i <= rows_i

        # --- per-head masked scores (tiny MXU matmuls, batched over b_tile) ---
        head_scores = []
        for h in range(N_HEADS):
            sl = slice(h * D_HEAD, (h + 1) * D_HEAD)
            s = jnp.einsum('ble,bse->bls', q3[:, :, sl], k3[:, :, sl],
                           preferred_element_type=jnp.float32)         # (BT, L, L)
            head_scores.append(jnp.where(keep, s, -1e30))

        # --- ONE softmax for all heads on the stacked (BT, H*L, L) tensor ---
        s_all = jnp.concatenate(head_scores, axis=1)                    # (BT, H*L, L)
        s_all = s_all - jnp.max(s_all, axis=-1, keepdims=True)
        p_all = jnp.exp(s_all)
        inv = pl.reciprocal(jnp.sum(p_all, axis=-1, keepdims=True), approx=True)
        a_all = p_all * inv

        # --- per-head A @ V, then concat heads on lanes ---
        head_outs = []
        for h in range(N_HEADS):
            a_h = a_all[:, h * seq:(h + 1) * seq, :]                    # (BT, L, L)
            v_h = v3[:, :, h * D_HEAD:(h + 1) * D_HEAD]                 # (BT, L, E)
            head_outs.append(jnp.einsum('bls,bse->ble', cast(a_h), cast(v_h),
                                        preferred_element_type=jnp.float32))

        attn = jnp.concatenate(head_outs, axis=-1).reshape(rows, d)     # (rows, D)

        # --- fused output projection: one K=64 matmul ---
        attn_out = jnp.dot(cast(attn), cast(wo_ref[...]),
                           preferred_element_type=jnp.float32) + bo_ref[...]

        # --- residual + LayerNorm1 ---
        x1 = _layernorm(xf + attn_out, g1_ref[...], be1_ref[...])

        # --- FFN: conv1d(k=1) -> relu -> conv1d(k=1)  (== two linear layers) ---
        y = jnp.dot(cast(x1), cast(w1_ref[...]), preferred_element_type=jnp.float32) + b1_ref[...]
        y = jnp.maximum(y, 0.0)
        y = jnp.dot(cast(y), cast(w2_ref[...]), preferred_element_type=jnp.float32) + b2_ref[...]

        # --- residual + LayerNorm2 ---
        o_ref[...] = _layernorm(x1 + y, g2_ref[...], be2_ref[...])

    return kernel


def _pick_b_tile(B, L, target_rows=256):
    """Largest divisor of B with B_TILE*L <= target_rows and rows%8 == 0."""
    cap = max(1, target_rows // L)
    best = None
    for c in range(1, B + 1):
        if B % c == 0 and c <= cap and (c * L) % 8 == 0:
            best = c
    if best is None:          # fall back to grid=1 (full-dim block is always legal)
        best = B
    return best


def attention_block(x, params, b_tile=None):
    B, L, D = x.shape
    assert D == D_MODEL
    if b_tile is None:
        b_tile = _pick_b_tile(B, L)
    assert B % b_tile == 0

    param_order = ["wq", "bq", "wk", "bk", "wv", "bv", "wo", "bo",
                   "w1", "b1", "w2", "b2", "g1", "be1", "g2", "be2"]
    plist = [params[n] for n in param_order]

    rows_per_block = b_tile * L
    x2 = x.reshape(B * L, D)          # free metadata reshape in the wrapper

    in_specs = [pl.BlockSpec((rows_per_block, D), lambda b: (b, 0))]
    for p in plist:
        in_specs.append(pl.BlockSpec(p.shape, lambda b, nd=p.ndim: (0,) * nd))

    out2 = pl.pallas_call(
        _make_kernel(b_tile, L),
        out_shape=jax.ShapeDtypeStruct((B * L, D), jnp.float32),
        grid_spec=pltpu.PrefetchScalarGridSpec(
            num_scalar_prefetch=0,
            grid=(B // b_tile,),
            in_specs=in_specs,
            out_specs=pl.BlockSpec((rows_per_block, D), lambda b: (b, 0)),
        ),
        compiler_params=pltpu.CompilerParams(
            dimension_semantics=("parallel",)),
    )(x2, *plist)
    return out2.reshape(B, L, D)


# ---------------------------- pure-JAX reference ----------------------------
def reference(x, p):
    B, L, D = x.shape
    q = (x @ p["wq"] + p["bq"]).reshape(B, L, N_HEADS, D_HEAD)
    k = (x @ p["wk"] + p["bk"]).reshape(B, L, N_HEADS, D_HEAD)
    v = (x @ p["wv"] + p["bv"]).reshape(B, L, N_HEADS, D_HEAD)
    scale = 1.0 / sqrt(D_HEAD)
    scores = jnp.einsum("blhe,bshe->bhls", q, k)
    mask = jnp.triu(jnp.ones((L, L), bool), k=1)
    scores = jnp.where(mask, -jnp.inf, scores)
    A = jax.nn.softmax(scale * scores, axis=-1)
    V = jnp.einsum("bhls,bshd->blhd", A, v).reshape(B, L, D)
    out = V @ p["wo"] + p["bo"]
    x1 = _layernorm(x + out, p["g1"], p["be1"])
    y = jnp.maximum(x1 @ p["w1"] + p["b1"], 0.0)
    y = y @ p["w2"] + p["b2"]
    return _layernorm(x1 + y, p["g2"], p["be2"])


def make_params(key):
    ks = jax.random.split(key, 16)

    def rnd(k, shape, s=0.05):
        return (s * jax.random.normal(k, shape)).astype(jnp.float32)

    # Linear / conv1d(k=1) weights stored pre-transposed: y = x @ W + b
    return {
        "wq": rnd(ks[0], (D_MODEL, D_MODEL)),
        "bq": rnd(ks[1], (1, D_MODEL)),
        "wk": rnd(ks[2], (D_MODEL, D_MODEL)),
        "bk": rnd(ks[3], (1, D_MODEL)),
        "wv": rnd(ks[4], (D_MODEL, D_MODEL)),
        "bv": rnd(ks[5], (1, D_MODEL)),
        "wo": rnd(ks[6], (D_MODEL, D_MODEL)),
        "bo": rnd(ks[7], (1, D_MODEL)),
        "w1": rnd(ks[8], (D_MODEL, D_FF)),
        "b1": rnd(ks[9], (1, D_FF)),
        "w2": rnd(ks[10], (D_FF, D_MODEL)),
        "b2": rnd(ks[11], (1, D_MODEL)),
        "g1": (1.0 + rnd(ks[12], (1, D_MODEL))),
        "be1": rnd(ks[13], (1, D_MODEL)),
        "g2": (1.0 + rnd(ks[14], (1, D_MODEL))),
        "be2": rnd(ks[15], (1, D_MODEL)),
    }


if __name__ == "__main__":
    key = jax.random.PRNGKey(0)
    k_x, k_p = jax.random.split(key)
    B, L = 2, 16
    x = jax.random.normal(k_x, (B, L, D_MODEL), dtype=jnp.float32)
    params = make_params(k_p)

    out = attention_block(x, params)
    out = jax.block_until_ready(out)

    ref = jax.block_until_ready(reference(x, params))
    assert out.shape == (B, L, D_MODEL)
    assert jnp.allclose(out, ref, rtol=2e-3, atol=2e-3), (
        float(jnp.max(jnp.abs(out - ref))))

    print("KERNEL_OK")
</pallas_src>

<mosaic_0001>
module attributes {stable_mosaic.version = 11 : i64} {
  func.func @kernel(%arg0: i32, %arg1: memref<32x64xf32, #tpu.memory_space<vmem>>, %arg2: memref<64x64xf32, #tpu.memory_space<vmem>>, %arg3: memref<1x64xf32, #tpu.memory_space<vmem>>, %arg4: memref<64x64xf32, #tpu.memory_space<vmem>>, %arg5: memref<1x64xf32, #tpu.memory_space<vmem>>, %arg6: memref<64x64xf32, #tpu.memory_space<vmem>>, %arg7: memref<1x64xf32, #tpu.memory_space<vmem>>, %arg8: memref<64x64xf32, #tpu.memory_space<vmem>>, %arg9: memref<1x64xf32, #tpu.memory_space<vmem>>, %arg10: memref<64x256xf32, #tpu.memory_space<vmem>>, %arg11: memref<1x256xf32, #tpu.memory_space<vmem>>, %arg12: memref<256x64xf32, #tpu.memory_space<vmem>>, %arg13: memref<1x64xf32, #tpu.memory_space<vmem>>, %arg14: memref<1x64xf32, #tpu.memory_space<vmem>>, %arg15: memref<1x64xf32, #tpu.memory_space<vmem>>, %arg16: memref<1x64xf32, #tpu.memory_space<vmem>>, %arg17: memref<1x64xf32, #tpu.memory_space<vmem>>, %arg18: memref<32x64xf32, #tpu.memory_space<vmem>>) attributes {dimension_semantics = [#tpu.dimension_semantics<parallel>], iteration_bounds = array<i64: 1>, scalar_prefetch = 0 : i64, scratch_operands = 0 : i64, tpu.core_type = #tpu.core_type<tc>, window_params = [{transform_indices = @transform_0, window_bounds = array<i64: 32, 64>}, {pipeline_mode = #tpu.pipeline_mode<synchronous>, transform_indices = @transform_1, window_bounds = array<i64: 64, 64>}, {pipeline_mode = #tpu.pipeline_mode<synchronous>, transform_indices = @transform_2, window_bounds = array<i64: 1, 64>}, {pipeline_mode = #tpu.pipeline_mode<synchronous>, transform_indices = @transform_3, window_bounds = array<i64: 64, 64>}, {pipeline_mode = #tpu.pipeline_mode<synchronous>, transform_indices = @transform_4, window_bounds = array<i64: 1, 64>}, {pipeline_mode = #tpu.pipeline_mode<synchronous>, transform_indices = @transform_5, window_bounds = array<i64: 64, 64>}, {pipeline_mode = #tpu.pipeline_mode<synchronous>, transform_indices = @transform_6, window_bounds = array<i64: 1, 64>}, {pipeline_mode = #tpu.pipeline_mode<synchronous>, transform_indices = @transform_7, window_bounds = array<i64: 64, 64>}, {pipeline_mode = #tpu.pipeline_mode<synchronous>, transform_indices = @transform_8, window_bounds = array<i64: 1, 64>}, {pipeline_mode = #tpu.pipeline_mode<synchronous>, transform_indices = @transform_9, window_bounds = array<i64: 64, 256>}, {pipeline_mode = #tpu.pipeline_mode<synchronous>, transform_indices = @transform_10, window_bounds = array<i64: 1, 256>}, {pipeline_mode = #tpu.pipeline_mode<synchronous>, transform_indices = @transform_11, window_bounds = array<i64: 256, 64>}, {pipeline_mode = #tpu.pipeline_mode<synchronous>, transform_indices = @transform_12, window_bounds = array<i64: 1, 64>}, {pipeline_mode = #tpu.pipeline_mode<synchronous>, transform_indices = @transform_13, window_bounds = array<i64: 1, 64>}, {pipeline_mode = #tpu.pipeline_mode<synchronous>, transform_indices = @transform_14, window_bounds = array<i64: 1, 64>}, {pipeline_mode = #tpu.pipeline_mode<synchronous>, transform_indices = @transform_15, window_bounds = array<i64: 1, 64>}, {pipeline_mode = #tpu.pipeline_mode<synchronous>, transform_indices = @transform_16, window_bounds = array<i64: 1, 64>}, {transform_indices = @transform_17, window_bounds = array<i64: 32, 64>}]} {
    %c0 = arith.constant 0 : index
    %c0_0 = arith.constant 0 : index
    %0 = vector.load %arg1[%c0, %c0_0] : memref<32x64xf32, #tpu.memory_space<vmem>>, vector<32x64xf32>
    %c0_1 = arith.constant 0 : index
    %c0_2 = arith.constant 0 : index
    %1 = vector.load %arg2[%c0_1, %c0_2] : memref<64x64xf32, #tpu.memory_space<vmem>>, vector<64x64xf32>
    %cst = arith.constant dense<0.000000e+00> : vector<32x64xf32>
    %2 = tpu.matmul %0, %1, %cst {dimension_numbers = #tpu.dot_dimension_numbers<[1], [0], [0], [1], [0, 0, 1, 1], [], []>} : vector<32x64xf32>, vector<64x64xf32>, vector<32x64xf32> -> vector<32x64xf32>
    %c0_3 = arith.constant 0 : index
    %c0_4 = arith.constant 0 : index
    %3 = vector.load %arg3[%c0_3, %c0_4] : memref<1x64xf32, #tpu.memory_space<vmem>>, vector<1x64xf32>
    %4 = vector.broadcast %3 : vector<1x64xf32> to vector<32x64xf32>
    %5 = arith.addf %2, %4 : vector<32x64xf32>
    %c0_5 = arith.constant 0 : index
    %c0_6 = arith.constant 0 : index
    %6 = vector.load %arg4[%c0_5, %c0_6] : memref<64x64xf32, #tpu.memory_space<vmem>>, vector<64x64xf32>
    %cst_7 = arith.constant dense<0.000000e+00> : vector<32x64xf32>
    %7 = tpu.matmul %0, %6, %cst_7 {dimension_numbers = #tpu.dot_dimension_numbers<[1], [0], [0], [1], [0, 0, 1, 1], [], []>} : vector<32x64xf32>, vector<64x64xf32>, vector<32x64xf32> -> vector<32x64xf32>
    %c0_8 = arith.constant 0 : index
    %c0_9 = arith.constant 0 : index
    %8 = vector.load %arg5[%c0_8, %c0_9] : memref<1x64xf32, #tpu.memory_space<vmem>>, vector<1x64xf32>
    %9 = vector.broadcast %8 : vector<1x64xf32> to vector<32x64xf32>
    %10 = arith.addf %7, %9 : vector<32x64xf32>
    %c0_10 = arith.constant 0 : index
    %c0_11 = arith.constant 0 : index
    %11 = vector.load %arg6[%c0_10, %c0_11] : memref<64x64xf32, #tpu.memory_space<vmem>>, vector<64x64xf32>
    %cst_12 = arith.constant dense<0.000000e+00> : vector<32x64xf32>
    %12 = tpu.matmul %0, %11, %cst_12 {dimension_numbers = #tpu.dot_dimension_numbers<[1], [0], [0], [1], [0, 0, 1, 1], [], []>} : vector<32x64xf32>, vector<64x64xf32>, vector<32x64xf32> -> vector<32x64xf32>
    %c0_13 = arith.constant 0 : index
    %c0_14 = arith.constant 0 : index
    %13 = vector.load %arg7[%c0_13, %c0_14] : memref<1x64xf32, #tpu.memory_space<vmem>>, vector<1x64xf32>
    %14 = vector.broadcast %13 : vector<1x64xf32> to vector<32x64xf32>
    %15 = arith.addf %12, %14 : vector<32x64xf32>
    %cst_15 = arith.constant 0.353553385 : f32
    %16 = vector.broadcast %cst_15 : f32 to vector<32x64xf32>
    %17 = arith.mulf %5, %16 : vector<32x64xf32>
    %18 = vector.shape_cast %17 : vector<32x64xf32> to vector<2x16x64xf32>
    %19 = vector.shape_cast %10 : vector<32x64xf32> to vector<2x16x64xf32>
    %20 = vector.shape_cast %15 : vector<32x64xf32> to vector<2x16x64xf32>
    %21 = tpu.iota {dimensions = array<i32: 1>} : vector<2x16x16xi32>
    %22 = tpu.iota {dimensions = array<i32: 2>} : vector<2x16x16xi32>
    %23 = arith.cmpi sle, %22, %21 : vector<2x16x16xi32>
    %24 = vector.extract_strided_slice %18 {offsets = [0, 0, 0], sizes = [2, 16, 8], strides = [1, 1, 1]} : vector<2x16x64xf32> to vector<2x16x8xf32>
    %25 = vector.extract_strided_slice %19 {offsets = [0, 0, 0], sizes = [2, 16, 8], strides = [1, 1, 1]} : vector<2x16x64xf32> to vector<2x16x8xf32>
    "tpu.trace_start"() <{level = 10 : i32, message = "ble,bse->bls"}> : () -> ()
    %cst_16 = arith.constant dense<0.000000e+00> : vector<2x16x16xf32>
    %26 = tpu.matmul %24, %25, %cst_16 {dimension_numbers = #tpu.dot_dimension_numbers<[2], [2], [1], [1], [0, 0, 0, 1, 1, 1], [0], [0]>} : vector<2x16x8xf32>, vector<2x16x8xf32>, vector<2x16x16xf32> -> vector<2x16x16xf32>
    %cst_17 = arith.constant -1.000000e+30 : f32
    "tpu.trace_stop"() : () -> ()
    %27 = vector.broadcast %cst_17 : f32 to vector<2x16x16xf32>
    %28 = arith.select %23, %26, %27 : vector<2x16x16xi1>, vector<2x16x16xf32>
    %29 = vector.extract_strided_slice %18 {offsets = [0, 0, 8], sizes = [2, 16, 8], strides = [1, 1, 1]} : vector<2x16x64xf32> to vector<2x16x8xf32>
    %30 = vector.extract_strided_slice %19 {offsets = [0, 0, 8], sizes = [2, 16, 8], strides = [1, 1, 1]} : vector<2x16x64xf32> to vector<2x16x8xf32>
    "tpu.trace_start"() <{level = 10 : i32, message = "ble,bse->bls"}> : () -> ()
    %cst_18 = arith.constant dense<0.000000e+00> : vector<2x16x16xf32>
    %31 = tpu.matmul %29, %30, %cst_18 {dimension_numbers = #tpu.dot_dimension_numbers<[2], [2], [1], [1], [0, 0, 0, 1, 1, 1], [0], [0]>} : vector<2x16x8xf32>, vector<2x16x8xf32>, vector<2x16x16xf32> -> vector<2x16x16xf32>
    %cst_19 = arith.constant -1.000000e+30 : f32
    "tpu.trace_stop"() : () -> ()
    %32 = vector.broadcast %cst_19 : f32 to vector<2x16x16xf32>
    %33 = arith.select %23, %31, %32 : vector<2x16x16xi1>, vector<2x16x16xf32>
    %34 = vector.extract_strided_slice %18 {offsets = [0, 0, 16], sizes = [2, 16, 8], strides = [1, 1, 1]} : vector<2x16x64xf32> to vector<2x16x8xf32>
    %35 = vector.extract_strided_slice %19 {offsets = [0, 0, 16], sizes = [2, 16, 8], strides = [1, 1, 1]} : vector<2x16x64xf32> to vector<2x16x8xf32>
    "tpu.trace_start"() <{level = 10 : i32, message = "ble,bse->bls"}> : () -> ()
    %cst_20 = arith.constant dense<0.000000e+00> : vector<2x16x16xf32>
    %36 = tpu.matmul %34, %35, %cst_20 {dimension_numbers = #tpu.dot_dimension_numbers<[2], [2], [1], [1], [0, 0, 0, 1, 1, 1], [0], [0]>} : vector<2x16x8xf32>, vector<2x16x8xf32>, vector<2x16x16xf32> -> vector<2x16x16xf32>
    %cst_21 = arith.constant -1.000000e+30 : f32
    "tpu.trace_stop"() : () -> ()
    %37 = vector.broadcast %cst_21 : f32 to vector<2x16x16xf32>
    %38 = arith.select %23, %36, %37 : vector<2x16x16xi1>, vector<2x16x16xf32>
    %39 = vector.extract_strided_slice %18 {offsets = [0, 0, 24], sizes = [2, 16, 8], strides = [1, 1, 1]} : vector<2x16x64xf32> to vector<2x16x8xf32>
    %40 = vector.extract_strided_slice %19 {offsets = [0, 0, 24], sizes = [2, 16, 8], strides = [1, 1, 1]} : vector<2x16x64xf32> to vector<2x16x8xf32>
    "tpu.trace_start"() <{level = 10 : i32, message = "ble,bse->bls"}> : () -> ()
    %cst_22 = arith.constant dense<0.000000e+00> : vector<2x16x16xf32>
    %41 = tpu.matmul %39, %40, %cst_22 {dimension_numbers = #tpu.dot_dimension_numbers<[2], [2], [1], [1], [0, 0, 0, 1, 1, 1], [0], [0]>} : vector<2x16x8xf32>, vector<2x16x8xf32>, vector<2x16x16xf32> -> vector<2x16x16xf32>
    %cst_23 = arith.constant -1.000000e+30 : f32
    "tpu.trace_stop"() : () -> ()
    %42 = vector.broadcast %cst_23 : f32 to vector<2x16x16xf32>
    %43 = arith.select %23, %41, %42 : vector<2x16x16xi1>, vector<2x16x16xf32>
    %44 = vector.extract_strided_slice %18 {offsets = [0, 0, 32], sizes = [2, 16, 8], strides = [1, 1, 1]} : vector<2x16x64xf32> to vector<2x16x8xf32>
    %45 = vector.extract_strided_slice %19 {offsets = [0, 0, 32], sizes = [2, 16, 8], strides = [1, 1, 1]} : vector<2x16x64xf32> to vector<2x16x8xf32>
    "tpu.trace_start"() <{level = 10 : i32, message = "ble,bse->bls"}> : () -> ()
    %cst_24 = arith.constant dense<0.000000e+00> : vector<2x16x16xf32>
    %46 = tpu.matmul %44, %45, %cst_24 {dimension_numbers = #tpu.dot_dimension_numbers<[2], [2], [1], [1], [0, 0, 0, 1, 1, 1], [0], [0]>} : vector<2x16x8xf32>, vector<2x16x8xf32>, vector<2x16x16xf32> -> vector<2x16x16xf32>
    %cst_25 = arith.constant -1.000000e+30 : f32
    "tpu.trace_stop"() : () -> ()
    %47 = vector.broadcast %cst_25 : f32 to vector<2x16x16xf32>
    %48 = arith.select %23, %46, %47 : vector<2x16x16xi1>, vector<2x16x16xf32>
    %49 = vector.extract_strided_slice %18 {offsets = [0, 0, 40], sizes = [2, 16, 8], strides = [1, 1, 1]} : vector<2x16x64xf32> to vector<2x16x8xf32>
    %50 = vector.extract_strided_slice %19 {offsets = [0, 0, 40], sizes = [2, 16, 8], strides = [1, 1, 1]} : vector<2x16x64xf32> to vector<2x16x8xf32>
    "tpu.trace_start"() <{level = 10 : i32, message = "ble,bse->bls"}> : () -> ()
    %cst_26 = arith.constant dense<0.000000e+00> : vector<2x16x16xf32>
    %51 = tpu.matmul %49, %50, %cst_26 {dimension_numbers = #tpu.dot_dimension_numbers<[2], [2], [1], [1], [0, 0, 0, 1, 1, 1], [0], [0]>} : vector<2x16x8xf32>, vector<2x16x8xf32>, vector<2x16x16xf32> -> vector<2x16x16xf32>
    %cst_27 = arith.constant -1.000000e+30 : f32
    "tpu.trace_stop"() : () -> ()
    %52 = vector.broadcast %cst_27 : f32 to vector<2x16x16xf32>
    %53 = arith.select %23, %51, %52 : vector<2x16x16xi1>, vector<2x16x16xf32>
    %54 = vector.extract_strided_slice %18 {offsets = [0, 0, 48], sizes = [2, 16, 8], strides = [1, 1, 1]} : vector<2x16x64xf32> to vector<2x16x8xf32>
    %55 = vector.extract_strided_slice %19 {offsets = [0, 0, 48], sizes = [2, 16, 8], strides = [1, 1, 1]} : vector<2x16x64xf32> to vector<2x16x8xf32>
    "tpu.trace_start"() <{level = 10 : i32, message = "ble,bse->bls"}> : () -> ()
    %cst_28 = arith.constant dense<0.000000e+00> : vector<2x16x16xf32>
    %56 = tpu.matmul %54, %55, %cst_28 {dimension_numbers = #tpu.dot_dimension_numbers<[2], [2], [1], [1], [0, 0, 0, 1, 1, 1], [0], [0]>} : vector<2x16x8xf32>, vector<2x16x8xf32>, vector<2x16x16xf32> -> vector<2x16x16xf32>
    %cst_29 = arith.constant -1.000000e+30 : f32
    "tpu.trace_stop"() : () -> ()
    %57 = vector.broadcast %cst_29 : f32 to vector<2x16x16xf32>
    %58 = arith.select %23, %56, %57 : vector<2x16x16xi1>, vector<2x16x16xf32>
    %59 = vector.extract_strided_slice %18 {offsets = [0, 0, 56], sizes = [2, 16, 8], strides = [1, 1, 1]} : vector<2x16x64xf32> to vector<2x16x8xf32>
    %60 = vector.extract_strided_slice %19 {offsets = [0, 0, 56], sizes = [2, 16, 8], strides = [1, 1, 1]} : vector<2x16x64xf32> to vector<2x16x8xf32>
    "tpu.trace_start"() <{level = 10 : i32, message = "ble,bse->bls"}> : () -> ()
    %cst_30 = arith.constant dense<0.000000e+00> : vector<2x16x16xf32>
    %61 = tpu.matmul %59, %60, %cst_30 {dimension_numbers = #tpu.dot_dimension_numbers<[2], [2], [1], [1], [0, 0, 0, 1, 1, 1], [0], [0]>} : vector<2x16x8xf32>, vector<2x16x8xf32>, vector<2x16x16xf32> -> vector<2x16x16xf32>
    %cst_31 = arith.constant -1.000000e+30 : f32
    "tpu.trace_stop"() : () -> ()
    %62 = vector.broadcast %cst_31 : f32 to vector<2x16x16xf32>
    %63 = arith.select %23, %61, %62 : vector<2x16x16xi1>, vector<2x16x16xf32>
    %64 = tpu.concatenate %28, %33, %38, %43, %48, %53, %58, %63 in 1 : vector<2x16x16xf32>, vector<2x16x16xf32>, vector<2x16x16xf32>, vector<2x16x16xf32>, vector<2x16x16xf32>, vector<2x16x16xf32>, vector<2x16x16xf32>, vector<2x16x16xf32> -> vector<2x128x16xf32>
    %cst_32 = arith.constant dense<0xFF800000> : vector<2x128xf32>
    %65 = vector.multi_reduction <maximumf>, %64, %cst_32 [2] : vector<2x128x16xf32> to vector<2x128xf32>
    %66 = vector.shape_cast %65 : vector<2x128xf32> to vector<2x128x1xf32>
    %67 = vector.broadcast %66 : vector<2x128x1xf32> to vector<2x128x16xf32>
    %68 = arith.subf %64, %67 : vector<2x128x16xf32>
    %69 = math.exp %68 : vector<2x128x16xf32>
    %cst_33 = arith.constant dense<0.000000e+00> : vector<2x128xf32>
    %70 = vector.multi_reduction <add>, %69, %cst_33 [2] : vector<2x128x16xf32> to vector<2x128xf32>
    %71 = vector.shape_cast %70 : vector<2x128xf32> to vector<2x128x1xf32>
    %72 = tpu.reciprocal %71 {approx = true} : vector<2x128x1xf32> -> vector<2x128x1xf32>
    %73 = vector.broadcast %72 : vector<2x128x1xf32> to vector<2x128x16xf32>
    %74 = arith.mulf %69, %73 : vector<2x128x16xf32>
    %75 = vector.extract_strided_slice %74 {offsets = [0, 0, 0], sizes = [2, 16, 16], strides = [1, 1, 1]} : vector<2x128x16xf32> to vector<2x16x16xf32>
    %76 = vector.extract_strided_slice %20 {offsets = [0, 0, 0], sizes = [2, 16, 8], strides = [1, 1, 1]} : vector<2x16x64xf32> to vector<2x16x8xf32>
    "tpu.trace_start"() <{level = 10 : i32, message = "bls,bse->ble"}> : () -> ()
    %cst_34 = arith.constant dense<0.000000e+00> : vector<2x16x8xf32>
    %77 = tpu.matmul %75, %76, %cst_34 {dimension_numbers = #tpu.dot_dimension_numbers<[2], [1], [1], [2], [0, 0, 0, 1, 1, 2], [0], [0]>} : vector<2x16x16xf32>, vector<2x16x8xf32>, vector<2x16x8xf32> -> vector<2x16x8xf32>
    "tpu.trace_stop"() : () -> ()
    %78 = vector.extract_strided_slice %74 {offsets = [0, 16, 0], sizes = [2, 16, 16], strides = [1, 1, 1]} : vector<2x128x16xf32> to vector<2x16x16xf32>
    %79 = vector.extract_strided_slice %20 {offsets = [0, 0, 8], sizes = [2, 16, 8], strides = [1, 1, 1]} : vector<2x16x64xf32> to vector<2x16x8xf32>
    "tpu.trace_start"() <{level = 10 : i32, message = "bls,bse->ble"}> : () -> ()
    %cst_35 = arith.constant dense<0.000000e+00> : vector<2x16x8xf32>
    %80 = tpu.matmul %78, %79, %cst_35 {dimension_numbers = #tpu.dot_dimension_numbers<[2], [1], [1], [2], [0, 0, 0, 1, 1, 2], [0], [0]>} : vector<2x16x16xf32>, vector<2x16x8xf32>, vector<2x16x8xf32> -> vector<2x16x8xf32>
    "tpu.trace_stop"() : () -> ()
    %81 = vector.extract_strided_slice %74 {offsets = [0, 32, 0], sizes = [2, 16, 16], strides = [1, 1, 1]} : vector<2x128x16xf32> to vector<2x16x16xf32>
    %82 = vector.extract_strided_slice %20 {offsets = [0, 0, 16], sizes = [2, 16, 8], strides = [1, 1, 1]} : vector<2x16x64xf32> to vector<2x16x8xf32>
    "tpu.trace_start"() <{level = 10 : i32, message = "bls,bse->ble"}> : () -> ()
    %cst_36 = arith.constant dense<0.000000e+00> : vector<2x16x8xf32>
    %83 = tpu.matmul %81, %82, %cst_36 {dimension_numbers = #tpu.dot_dimension_numbers<[2], [1], [1], [2], [0, 0, 0, 1, 1, 2], [0], [0]>} : vector<2x16x16xf32>, vector<2x16x8xf32>, vector<2x16x8xf32> -> vector<2x16x8xf32>
    "tpu.trace_stop"() : () -> ()
    %84 = vector.extract_strided_slice %74 {offsets = [0, 48, 0], sizes = [2, 16, 16], strides = [1, 1, 1]} : vector<2x128x16xf32> to vector<2x16x16xf32>
    %85 = vector.extract_strided_slice %20 {offsets = [0, 0, 24], sizes = [2, 16, 8], strides = [1, 1, 1]} : vector<2x16x64xf32> to vector<2x16x8xf32>
    "tpu.trace_start"() <{level = 10 : i32, message = "bls,bse->ble"}> : () -> ()
    %cst_37 = arith.constant dense<0.000000e+00> : vector<2x16x8xf32>
    %86 = tpu.matmul %84, %85, %cst_37 {dimension_numbers = #tpu.dot_dimension_numbers<[2], [1], [1], [2], [0, 0, 0, 1, 1, 2], [0], [0]>} : vector<2x16x16xf32>, vector<2x16x8xf32>, vector<2x16x8xf32> -> vector<2x16x8xf32>
    "tpu.trace_stop"() : () -> ()
    %87 = vector.extract_strided_slice %74 {offsets = [0, 64, 0], sizes = [2, 16, 16], strides = [1, 1, 1]} : vector<2x128x16xf32> to vector<2x16x16xf32>
    %88 = vector.extract_strided_slice %20 {offsets = [0, 0, 32], sizes = [2, 16, 8], strides = [1, 1, 1]} : vector<2x16x64xf32> to vector<2x16x8xf32>
    "tpu.trace_start"() <{level = 10 : i32, message = "bls,bse->ble"}> : () -> ()
    %cst_38 = arith.constant dense<0.000000e+00> : vector<2x16x8xf32>
    %89 = tpu.matmul %87, %88, %cst_38 {dimension_numbers = #tpu.dot_dimension_numbers<[2], [1], [1], [2], [0, 0, 0, 1, 1, 2], [0], [0]>} : vector<2x16x16xf32>, vector<2x16x8xf32>, vector<2x16x8xf32> -> vector<2x16x8xf32>
    "tpu.trace_stop"() : () -> ()
    %90 = vector.extract_strided_slice %74 {offsets = [0, 80, 0], sizes = [2, 16, 16], strides = [1, 1, 1]} : vector<2x128x16xf32> to vector<2x16x16xf32>
    %91 = vector.extract_strided_slice %20 {offsets = [0, 0, 40], sizes = [2, 16, 8], strides = [1, 1, 1]} : vector<2x16x64xf32> to vector<2x16x8xf32>
    "tpu.trace_start"() <{level = 10 : i32, message = "bls,bse->ble"}> : () -> ()
    %cst_39 = arith.constant dense<0.000000e+00> : vector<2x16x8xf32>
    %92 = tpu.matmul %90, %91, %cst_39 {dimension_numbers = #tpu.dot_dimension_numbers<[2], [1], [1], [2], [0, 0, 0, 1, 1, 2], [0], [0]>} : vector<2x16x16xf32>, vector<2x16x8xf32>, vector<2x16x8xf32> -> vector<2x16x8xf32>
    "tpu.trace_stop"() : () -> ()
    %93 = vector.extract_strided_slice %74 {offsets = [0, 96, 0], sizes = [2, 16, 16], strides = [1, 1, 1]} : vector<2x128x16xf32> to vector<2x16x16xf32>
    %94 = vector.extract_strided_slice %20 {offsets = [0, 0, 48], sizes = [2, 16, 8], strides = [1, 1, 1]} : vector<2x16x64xf32> to vector<2x16x8xf32>
    "tpu.trace_start"() <{level = 10 : i32, message = "bls,bse->ble"}> : () -> ()
    %cst_40 = arith.constant dense<0.000000e+00> : vector<2x16x8xf32>
    %95 = tpu.matmul %93, %94, %cst_40 {dimension_numbers = #tpu.dot_dimension_numbers<[2], [1], [1], [2], [0, 0, 0, 1, 1, 2], [0], [0]>} : vector<2x16x16xf32>, vector<2x16x8xf32>, vector<2x16x8xf32> -> vector<2x16x8xf32>
    "tpu.trace_stop"() : () -> ()
    %96 = vector.extract_strided_slice %74 {offsets = [0, 112, 0], sizes = [2, 16, 16], strides = [1, 1, 1]} : vector<2x128x16xf32> to vector<2x16x16xf32>
    %97 = vector.extract_strided_slice %20 {offsets = [0, 0, 56], sizes = [2, 16, 8], strides = [1, 1, 1]} : vector<2x16x64xf32> to vector<2x16x8xf32>
    "tpu.trace_start"() <{level = 10 : i32, message = "bls,bse->ble"}> : () -> ()
    %cst_41 = arith.constant dense<0.000000e+00> : vector<2x16x8xf32>
    %98 = tpu.matmul %96, %97, %cst_41 {dimension_numbers = #tpu.dot_dimension_numbers<[2], [1], [1], [2], [0, 0, 0, 1, 1, 2], [0], [0]>} : vector<2x16x16xf32>, vector<2x16x8xf32>, vector<2x16x8xf32> -> vector<2x16x8xf32>
    "tpu.trace_stop"() : () -> ()
    %99 = tpu.concatenate %77, %80, %83, %86, %89, %92, %95, %98 in 2 : vector<2x16x8xf32>, vector<2x16x8xf32>, vector<2x16x8xf32>, vector<2x16x8xf32>, vector<2x16x8xf32>, vector<2x16x8xf32>, vector<2x16x8xf32>, vector<2x16x8xf32> -> vector<2x16x64xf32>
    %100 = vector.shape_cast %99 : vector<2x16x64xf32> to vector<32x64xf32>
    %c0_42 = arith.constant 0 : index
    %c0_43 = arith.constant 0 : index
    %101 = vector.load %arg8[%c0_42, %c0_43] : memref<64x64xf32, #tpu.memory_space<vmem>>, vector<64x64xf32>
    %cst_44 = arith.constant dense<0.000000e+00> : vector<32x64xf32>
    %102 = tpu.matmul %100, %101, %cst_44 {dimension_numbers = #tpu.dot_dimension_numbers<[1], [0], [0], [1], [0, 0, 1, 1], [], []>} : vector<32x64xf32>, vector<64x64xf32>, vector<32x64xf32> -> vector<32x64xf32>
    %c0_45 = arith.constant 0 : index
    %c0_46 = arith.constant 0 : index
    %103 = vector.load %arg9[%c0_45, %c0_46] : memref<1x64xf32, #tpu.memory_space<vmem>>, vector<1x64xf32>
    %104 = vector.broadcast %103 : vector<1x64xf32> to vector<32x64xf32>
    %105 = arith.addf %102, %104 : vector<32x64xf32>
    %106 = arith.addf %0, %105 : vector<32x64xf32>
    %c0_47 = arith.constant 0 : index
    %c0_48 = arith.constant 0 : index
    %107 = vector.load %arg14[%c0_47, %c0_48] : memref<1x64xf32, #tpu.memory_space<vmem>>, vector<1x64xf32>
    %c0_49 = arith.constant 0 : index
    %c0_50 = arith.constant 0 : index
    %108 = vector.load %arg15[%c0_49, %c0_50] : memref<1x64xf32, #tpu.memory_space<vmem>>, vector<1x64xf32>
    %cst_51 = arith.constant dense<0.000000e+00> : vector<32xf32>
    %109 = vector.multi_reduction <add>, %106, %cst_51 [1] : vector<32x64xf32> to vector<32xf32>
    %110 = vector.shape_cast %109 : vector<32xf32> to vector<32x1xf32>
    %cst_52 = arith.constant 6.400000e+01 : f32
    %111 = vector.broadcast %cst_52 : f32 to vector<32x1xf32>
    %112 = arith.divf %110, %111 : vector<32x1xf32>
    %113 = vector.broadcast %112 : vector<32x1xf32> to vector<32x64xf32>
    %114 = arith.subf %106, %113 : vector<32x64xf32>
    %115 = arith.mulf %114, %114 : vector<32x64xf32>
    %cst_53 = arith.constant dense<0.000000e+00> : vector<32xf32>
    %116 = vector.multi_reduction <add>, %115, %cst_53 [1] : vector<32x64xf32> to vector<32xf32>
    %117 = vector.shape_cast %116 : vector<32xf32> to vector<32x1xf32>
    %cst_54 = arith.constant 6.400000e+01 : f32
    %118 = vector.broadcast %cst_54 : f32 to vector<32x1xf32>
    %119 = arith.divf %117, %118 : vector<32x1xf32>
    %120 = vector.broadcast %112 : vector<32x1xf32> to vector<32x64xf32>
    %121 = arith.subf %106, %120 : vector<32x64xf32>
    %cst_55 = arith.constant 9.99999974E-6 : f32
    %122 = vector.broadcast %cst_55 : f32 to vector<32x1xf32>
    %123 = arith.addf %119, %122 : vector<32x1xf32>
    %124 = math.rsqrt %123 : vector<32x1xf32>
    %125 = vector.broadcast %124 : vector<32x1xf32> to vector<32x64xf32>
    %126 = arith.mulf %121, %125 : vector<32x64xf32>
    %127 = vector.broadcast %107 : vector<1x64xf32> to vector<32x64xf32>
    %128 = arith.mulf %126, %127 : vector<32x64xf32>
    %129 = vector.broadcast %108 : vector<1x64xf32> to vector<32x64xf32>
    %130 = arith.addf %128, %129 : vector<32x64xf32>
    %c0_56 = arith.constant 0 : index
    %c0_57 = arith.constant 0 : index
    %131 = vector.load %arg10[%c0_56, %c0_57] : memref<64x256xf32, #tpu.memory_space<vmem>>, vector<64x256xf32>
    %cst_58 = arith.constant dense<0.000000e+00> : vector<32x256xf32>
    %132 = tpu.matmul %130, %131, %cst_58 {dimension_numbers = #tpu.dot_dimension_numbers<[1], [0], [0], [1], [0, 0, 1, 1], [], []>} : vector<32x64xf32>, vector<64x256xf32>, vector<32x256xf32> -> vector<32x256xf32>
    %c0_59 = arith.constant 0 : index
    %c0_60 = arith.constant 0 : index
    %133 = vector.load %arg11[%c0_59, %c0_60] : memref<1x256xf32, #tpu.memory_space<vmem>>, vector<1x256xf32>
    %134 = vector.broadcast %133 : vector<1x256xf32> to vector<32x256xf32>
    %135 = arith.addf %132, %134 : vector<32x256xf32>
    %cst_61 = arith.constant 0.000000e+00 : f32
    %136 = vector.broadcast %cst_61 : f32 to vector<32x256xf32>
    %137 = arith.maximumf %135, %136 : vector<32x256xf32>
    %c0_62 = arith.constant 0 : index
    %c0_63 = arith.constant 0 : index
    %138 = vector.load %arg12[%c0_62, %c0_63] : memref<256x64xf32, #tpu.memory_space<vmem>>, vector<256x64xf32>
    %cst_64 = arith.constant dense<0.000000e+00> : vector<32x64xf32>
    %139 = tpu.matmul %137, %138, %cst_64 {dimension_numbers = #tpu.dot_dimension_numbers<[1], [0], [0], [1], [0, 0, 1, 1], [], []>} : vector<32x256xf32>, vector<256x64xf32>, vector<32x64xf32> -> vector<32x64xf32>
    %c0_65 = arith.constant 0 : index
    %c0_66 = arith.constant 0 : index
    %140 = vector.load %arg13[%c0_65, %c0_66] : memref<1x64xf32, #tpu.memory_space<vmem>>, vector<1x64xf32>
    %141 = vector.broadcast %140 : vector<1x64xf32> to vector<32x64xf32>
    %142 = arith.addf %139, %141 : vector<32x64xf32>
    %143 = arith.addf %130, %142 : vector<32x64xf32>
    %c0_67 = arith.constant 0 : index
    %c0_68 = arith.constant 0 : index
    %144 = vector.load %arg16[%c0_67, %c0_68] : memref<1x64xf32, #tpu.memory_space<vmem>>, vector<1x64xf32>
    %c0_69 = arith.constant 0 : index
    %c0_70 = arith.constant 0 : index
    %145 = vector.load %arg17[%c0_69, %c0_70] : memref<1x64xf32, #tpu.memory_space<vmem>>, vector<1x64xf32>
    %cst_71 = arith.constant dense<0.000000e+00> : vector<32xf32>
    %146 = vector.multi_reduction <add>, %143, %cst_71 [1] : vector<32x64xf32> to vector<32xf32>
    %147 = vector.shape_cast %146 : vector<32xf32> to vector<32x1xf32>
    %cst_72 = arith.constant 6.400000e+01 : f32
    %148 = vector.broadcast %cst_72 : f32 to vector<32x1xf32>
    %149 = arith.divf %147, %148 : vector<32x1xf32>
    %150 = vector.broadcast %149 : vector<32x1xf32> to vector<32x64xf32>
    %151 = arith.subf %143, %150 : vector<32x64xf32>
    %152 = arith.mulf %151, %151 : vector<32x64xf32>
    %cst_73 = arith.constant dense<0.000000e+00> : vector<32xf32>
    %153 = vector.multi_reduction <add>, %152, %cst_73 [1] : vector<32x64xf32> to vector<32xf32>
    %154 = vector.shape_cast %153 : vector<32xf32> to vector<32x1xf32>
    %cst_74 = arith.constant 6.400000e+01 : f32
    %155 = vector.broadcast %cst_74 : f32 to vector<32x1xf32>
    %156 = arith.divf %154, %155 : vector<32x1xf32>
    %157 = vector.broadcast %149 : vector<32x1xf32> to vector<32x64xf32>
    %158 = arith.subf %143, %157 : vector<32x64xf32>
    %cst_75 = arith.constant 9.99999974E-6 : f32
    %159 = vector.broadcast %cst_75 : f32 to vector<32x1xf32>
    %160 = arith.addf %156, %159 : vector<32x1xf32>
    %161 = math.rsqrt %160 : vector<32x1xf32>
    %162 = vector.broadcast %161 : vector<32x1xf32> to vector<32x64xf32>
    %163 = arith.mulf %158, %162 : vector<32x64xf32>
    %164 = vector.broadcast %144 : vector<1x64xf32> to vector<32x64xf32>
    %165 = arith.mulf %163, %164 : vector<32x64xf32>
    %166 = vector.broadcast %145 : vector<1x64xf32> to vector<32x64xf32>
    %167 = arith.addf %165, %166 : vector<32x64xf32>
    %c0_76 = arith.constant 0 : index
    %c0_77 = arith.constant 0 : index
    %168 = vector.load %arg18[%c0_76, %c0_77] : memref<32x64xf32, #tpu.memory_space<vmem>>, vector<32x64xf32>
    tpu.vector_store %arg18[%c0_76, %c0_77], %167 {strides = array<i32>} : memref<32x64xf32, #tpu.memory_space<vmem>>, vector<32x64xf32>,
    return
  }
  func.func @transform_0(%arg0: i32) -> (i32, i32) {
    %c0_i32 = arith.constant 0 : i32
    %c0_i32_0 = arith.constant 0 : i32
    return %arg0, %c0_i32 : i32, i32
  }
  func.func @transform_1(%arg0: i32) -> (i32, i32) {
    %c0_i32 = arith.constant 0 : i32
    %c0_i32_0 = arith.constant 0 : i32
    %c0_i32_1 = arith.constant 0 : i32
    return %c0_i32, %c0_i32_0 : i32, i32
  }
  func.func @transform_2(%arg0: i32) -> (i32, i32) {
    %c0_i32 = arith.constant 0 : i32
    %c0_i32_0 = arith.constant 0 : i32
    %c0_i32_1 = arith.constant 0 : i32
    return %c0_i32, %c0_i32_0 : i32, i32
  }
  func.func @transform_3(%arg0: i32) -> (i32, i32) {
    %c0_i32 = arith.constant 0 : i32
    %c0_i32_0 = arith.constant 0 : i32
    %c0_i32_1 = arith.constant 0 : i32
    return %c0_i32, %c0_i32_0 : i32, i32
  }
  func.func @transform_4(%arg0: i32) -> (i32, i32) {
    %c0_i32 = arith.constant 0 : i32
    %c0_i32_0 = arith.constant 0 : i32
    %c0_i32_1 = arith.constant 0 : i32
    return %c0_i32, %c0_i32_0 : i32, i32
  }
  func.func @transform_5(%arg0: i32) -> (i32, i32) {
    %c0_i32 = arith.constant 0 : i32
    %c0_i32_0 = arith.constant 0 : i32
    %c0_i32_1 = arith.constant 0 : i32
    return %c0_i32, %c0_i32_0 : i32, i32
  }
  func.func @transform_6(%arg0: i32) -> (i32, i32) {
    %c0_i32 = arith.constant 0 : i32
    %c0_i32_0 = arith.constant 0 : i32
    %c0_i32_1 = arith.constant 0 : i32
    return %c0_i32, %c0_i32_0 : i32, i32
  }
  func.func @transform_7(%arg0: i32) -> (i32, i32) {
    %c0_i32 = arith.constant 0 : i32
    %c0_i32_0 = arith.constant 0 : i32
    %c0_i32_1 = arith.constant 0 : i32
    return %c0_i32, %c0_i32_0 : i32, i32
  }
  func.func @transform_8(%arg0: i32) -> (i32, i32) {
    %c0_i32 = arith.constant 0 : i32
    %c0_i32_0 = arith.constant 0 : i32
    %c0_i32_1 = arith.constant 0 : i32
    return %c0_i32, %c0_i32_0 : i32, i32
  }
  func.func @transform_9(%arg0: i32) -> (i32, i32) {
    %c0_i32 = arith.constant 0 : i32
    %c0_i32_0 = arith.constant 0 : i32
    %c0_i32_1 = arith.constant 0 : i32
    return %c0_i32, %c0_i32_0 : i32, i32
  }
  func.func @transform_10(%arg0: i32) -> (i32, i32) {
    %c0_i32 = arith.constant 0 : i32
    %c0_i32_0 = arith.constant 0 : i32
    %c0_i32_1 = arith.constant 0 : i32
    return %c0_i32, %c0_i32_0 : i32, i32
  }
  func.func @transform_11(%arg0: i32) -> (i32, i32) {
    %c0_i32 = arith.constant 0 : i32
    %c0_i32_0 = arith.constant 0 : i32
    %c0_i32_1 = arith.constant 0 : i32
    return %c0_i32, %c0_i32_0 : i32, i32
  }
  func.func @transform_12(%arg0: i32) -> (i32, i32) {
    %c0_i32 = arith.constant 0 : i32
    %c0_i32_0 = arith.constant 0 : i32
    %c0_i32_1 = arith.constant 0 : i32
    return %c0_i32, %c0_i32_0 : i32, i32
  }
  func.func @transform_13(%arg0: i32) -> (i32, i32) {
    %c0_i32 = arith.constant 0 : i32
    %c0_i32_0 = arith.constant 0 : i32
    %c0_i32_1 = arith.constant 0 : i32
    return %c0_i32, %c0_i32_0 : i32, i32
  }
  func.func @transform_14(%arg0: i32) -> (i32, i32) {
    %c0_i32 = arith.constant 0 : i32
    %c0_i32_0 = arith.constant 0 : i32
    %c0_i32_1 = arith.constant 0 : i32
    return %c0_i32, %c0_i32_0 : i32, i32
  }
  func.func @transform_15(%arg0: i32) -> (i32, i32) {
    %c0_i32 = arith.constant 0 : i32
    %c0_i32_0 = arith.constant 0 : i32
    %c0_i32_1 = arith.constant 0 : i32
    return %c0_i32, %c0_i32_0 : i32, i32
  }
  func.func @transform_16(%arg0: i32) -> (i32, i32) {
    %c0_i32 = arith.constant 0 : i32
    %c0_i32_0 = arith.constant 0 : i32
    %c0_i32_1 = arith.constant 0 : i32
    return %c0_i32, %c0_i32_0 : i32, i32
  }
  func.func @transform_17(%arg0: i32) -> (i32, i32) {
    %c0_i32 = arith.constant 0 : i32
    %c0_i32_0 = arith.constant 0 : i32
    return %arg0, %c0_i32 : i32, i32
  }
}

</mosaic_0001>

<bundles_post_ra>
// kernel: tpu_custom_call.1
= control target key start
LH: loop header
LB: loop body
LE: loop exit
PB: predicated region body
PF: predicated region fallthrough
CT: control target
= control target key end

     0   :  { %s4212_s0 = inlined_call_operand.hbm [shape: f32[32,64], index: 0, kind: input, shape index: {}]   ;;  %s4213_s1 = inlined_call_operand.vmem [shape: f32[64,64], index: 1, kind: input, shape index: {}]   ;;  %s4214_s2 = inlined_call_operand.hbm [shape: f32[1,64], index: 2, kind: input, shape index: {}]   ;;  %s4215_s3 = inlined_call_operand.vmem [shape: f32[64,64], index: 3, kind: input, shape index: {}]   ;;  %s4216_s4 = inlined_call_operand.hbm [shape: f32[1,64], index: 4, kind: input, shape index: {}]   ;;  %s4217_s5 = inlined_call_operand.vmem [shape: f32[64,64], index: 5, kind: input, shape index: {}]   ;;  %s4218_s6 = inlined_call_operand.vmem [shape: f32[1,64], index: 6, kind: input, shape index: {}]   ;;  %s4219_s7 = inlined_call_operand.vmem [shape: f32[64,64], index: 7, kind: input, shape index: {}]   ;;  %s4220_s8 = inlined_call_operand.vmem [shape: f32[1,64], index: 8, kind: input, shape index: {}]   ;;  %s4221_s9 = inlined_call_operand.vmem [shape: f32[64,256], index: 9, kind: input, shape index: {}]   ;;  %s4222_s10 = inlined_call_operand.vmem [shape: f32[1,256], index: 10, kind: input, shape index: {}]   ;;  %s4223_s11 = inlined_call_operand.vmem [shape: f32[256,64], index: 11, kind: input, shape index: {}]   ;;  %s4224_s12 = inlined_call_operand.vmem [shape: f32[1,64], index: 12, kind: input, shape index: {}]   ;;  %s4225_s13 = inlined_call_operand.vmem [shape: f32[1,64], index: 13, kind: input, shape index: {}]   ;;  %s4226_s14 = inlined_call_operand.vmem [shape: f32[1,64], index: 14, kind: input, shape index: {}]   ;;  %s4227_s15 = inlined_call_operand.vmem [shape: f32[1,64], index: 15, kind: input, shape index: {}]   ;;  %s4228_s16 = inlined_call_operand.vmem [shape: f32[1,64], index: 16, kind: input, shape index: {}]   ;;  %s4229_s17 = inlined_call_operand.hbm [shape: f32[32,64], index: 17, kind: output, shape index: {}]  }
   0x1   :  { %4231 = sst [smem:[#allocation12_spill]] %s4212_s0 }
   0x2   :  { %4232 = sst [smem:[#allocation13_spill]] %s4213_s1 }
   0x3   :  { %22 = vsyncpa [#allocation3], 0 }
   0x4   :  { %23 = vsyncpa [#allocation6], 0  ;;  %s45_s26 = sshll.u32 %s4214_s2, 4  ;;  %s46_s26 = int_to_ptr.hbm [resolvable:$true] %s45_s26 }
   0x5   :  { %24 = vsyncpa [#allocation4], 0  ;;  %s2923_s27 = smov [#allocation5]   ;;  %s4233_s30 = sld [smem:[#allocation12_spill]] }
   0x6   :  { %s47_s28 = sshll.u32 %s2923_s27, 4  ;;  %s2924_s19 = smov [#allocation2]   ;;  %s48_s28 = int_to_ptr.vmem [resolvable:$true] %s47_s28 }
   0x7   :  { %50 = dma.hbm_to_vmem [thread:$0]  %s46_s26, 16, %s48_s28, [#allocation6]  }
   0x8   :  { %s31_s1 = sshll.u32 %s2924_s19, 4  ;;  %s2925_s20 = smov 128   ;;  %s32_s1 = int_to_ptr.vmem [resolvable:$true] %s31_s1 }
   0x9   :  { %s2926_s21 = smov 8   ;;  %s58_s23 = sshll.u32 %s4216_s4, 4  ;;  %s59_s23 = int_to_ptr.hbm [resolvable:$true] %s58_s23 }
   0xa   :  { %s2927_s24 = smov [#allocation7]  }
   0xb   :  { %s29_s18 = sshll.u32 %s4233_s30, 4  ;;  %s60_s25 = sshll.u32 %s2927_s24, 4  ;;  %s30_s18 = int_to_ptr.hbm [resolvable:$true] %s29_s18  ;;  %s61_s25 = int_to_ptr.vmem [resolvable:$true] %s60_s25 }
   0xc   :  { %37 = dma.hbm_to_vmem [thread:$0]  %s30_s18, 512, %s32_s1, [#allocation3], %s2925_s20, %s2925_s20, %s2926_s21  }
   0xd   :  { %63 = dma.hbm_to_vmem [thread:$0]  %s59_s23, 16, %s61_s25, [#allocation6]  }
   0xe   :  { %2917 = dma.done.wait [#allocation3], 512  }
   0xf   :  { %2918 = vsyncadd [#allocation3], 4294966784 }
  0x10   :  { %2919 = dma.done.wait [#allocation6], 32  }
  0x11   :  { %2920 = vsyncadd [#allocation6], 4294967264  ;;  %v165_v0 = vld [vmem:[%s4215_s3 + $0x38] sm:$0xff]  ;;  %v164_v1 = vld [vmem:[%s4215_s3 + $0x30] sm:$0xff]  ;;  %s4234_s30 = sld [smem:[#allocation13_spill]]  ;;  %vm116_vm0 = vcmask 523264  }
  0x12   :  { %178 = vmatpush.msra.mxu1 %v165_v0  ;;  %2564 = vmatpush.msra.mxu3 %v165_v0  ;;  %v163_v4 = vld [vmem:[%s4215_s3 + $0x28] sm:$0xff]  ;;  %v162_v6 = vld [vmem:[%s4215_s3 + $0x20] sm:$0xff]  ;;  %v161_v8 = vld [vmem:[%s4215_s3 + $0x18] sm:$0xff]  ;;  %s2929_s0 = smov 104   ;;  %s2930_s4 = smov 120   ;;  %vm251_vm1 = vcmask 64512  }
  0x13   :  { %v206_v9 = vld [vmem:[%s4217_s5 + $0x38] sm:$0xff]  ;;  %v205_v11 = vld [vmem:[%s4217_s5 + $0x30] sm:$0xff]  ;;  %v159_v13 = vld [vmem:[%s4215_s3 + $0x8] sm:$0xff]  ;;  %s2931_s18 = smov 96   ;;  %s2932_s19 = smov 112   ;;  %vm900_vm3 = vcmask 130048  }
  0x14   :  { %179 = vmatpush.msra.mxu1 %v164_v1  ;;  %2565 = vmatpush.msra.mxu3 %v164_v1  ;;  %v160_v12 = vld [vmem:[%s4215_s3 + $0x10] sm:$0xff]  ;;  %v204_v16 = vld [vmem:[%s4217_s5 + $0x28] sm:$0xff]  ;;  %v203_v17 = vld [vmem:[%s4217_s5 + $0x20] sm:$0xff]  ;;  %s2933_s1 = smov 88   ;;  %s2934_s2 = smov 72   ;;  %vm1925_vm5 = vcmask 195584  }
  0x15   :  { %219 = vmatpush.msra.mxu2 %v206_v9  ;;  %v158_v18 = vld [vmem:[%s4215_s3] sm:$0xff]  ;;  %v103_v21 = vld [vmem:[#allocation2 + $0x18] sm:$0xff]  ;;  %v201_v23 = vld [vmem:[%s4217_s5 + $0x10] sm:$0xff]  ;;  %s2936_s24 = smov 32   ;;  %s2937_s25 = smov 24   ;;  %vm1930_vm6 = vcmask 261120  }
  0x16   :  { %180 = vmatpush.msra.mxu1 %v163_v4  ;;  %2566 = vmatpush.msra.mxu3 %v163_v4  ;;  %v100_v19 = vld [vmem:[#allocation2] sm:$0xff]  ;;  %v202_v22 = vld [vmem:[%s4217_s5 + $0x18] sm:$0xff]  ;;  %v200_v24 = vld [vmem:[%s4217_s5 + $0x8] sm:$0xff]  ;;  %s2938_s3 = smov 48   ;;  %s2939_s26 = smov 40   ;;  %vm1935_vm7 = vcmask 326656  }
  0x17   :  { %v111_v2 = vld [vmem:[%s4234_s30 + $0x38] sm:$0xff]  ;;  %v110_v3 = vld [vmem:[%s4234_s30 + $0x30] sm:$0xff]  ;;  %v109_v5 = vld [vmem:[%s4234_s30 + $0x28] sm:$0xff]  ;;  %220 = vmatpush.msra.mxu2 %v205_v11  ;;  %vm1940_vm8 = vcmask 392192   ;;  %vm1945_vm9 = vcmask 457728  }
  0x18   :  { %137 = vmatpush.msra.mxu0 %v111_v2  ;;  %v108_v7 = vld [vmem:[%s4234_s30 + $0x20] sm:$0xff]  ;;  %181 = vmatpush.msra.mxu1 %v162_v6  ;;  %v107_v10 = vld [vmem:[%s4234_s30 + $0x18] sm:$0xff]  ;;  %v106_v14 = vld [vmem:[%s4234_s30 + $0x10] sm:$0xff] }
  0x19   :  { %2567 = vmatpush.msra.mxu3 %v162_v6  ;;  %v105_v15 = vld [vmem:[%s4234_s30 + $0x8] sm:$0xff]  ;;  %221 = vmatpush.msra.mxu2 %v204_v16  ;;  %v104_v20 = vld [vmem:[%s4234_s30] sm:$0xff]  ;;  %v102_v27 = vld [vmem:[#allocation2 + $0x10] sm:$0xff]  ;;  %s2940_s30 = smov 56  }
  0x1a   :  { %138 = vmatpush.msra.mxu0 %v110_v3  ;;  %182 = vmatpush.msra.mxu1 %v161_v8  ;;  %v101_v25 = vld [vmem:[#allocation2 + $0x8] sm:$0xff]  ;;  %v199_v26 = vld [vmem:[%s4217_s5] sm:$0xff]  ;;  %s2928_s5 = smov 80  }
  0x1b   :  { %2568 = vmatpush.msra.mxu3 %v161_v8  ;;  %222 = vmatpush.msra.mxu2 %v203_v17  ;;  %v2662_v28 = vld [vmem:[#allocation7] ss:$0 sm:$0xff]  ;;  %v2663_v30 = vld [vmem:[#allocation5] ss:$0 sm:$0xff] }
  0x1c   :  { %139 = vmatpush.msra.mxu0 %v109_v5  ;;  %183 = vmatpush.msra.mxu1 %v160_v12  ;;  %v2664_v51 = vld [vmem:[%s4218_s6] ss:$0 sm:$0xff]  ;;  %s2935_s6 = smov 16  }
  0x1d   :  { %2569 = vmatpush.msra.mxu3 %v160_v12  ;;  %223 = vmatpush.msra.mxu2 %v202_v22 }
  0x1e   :  { %140 = vmatpush.msra.mxu0 %v108_v7  ;;  %184 = vmatpush.msra.mxu1 %v159_v13 }
  0x1f   :  { %2570 = vmatpush.msra.mxu3 %v159_v13  ;;  %224 = vmatpush.msra.mxu2 %v201_v23 }
  0x20   :  { %141 = vmatpush.msra.mxu0 %v107_v10  ;;  %185 = vmatpush.msra.mxu1 %v158_v18 }
  0x21   :  { %2571 = vmatpush.msra.mxu3 %v158_v18  ;;  %2448 = vmatmul.msk.f32.vlgmr.msra.gmra.mxu1 %vm116_vm0, %v100_v19 }
  0x22   :  { %142 = vmatpush.msra.mxu0 %v106_v14  ;;  %2451 = vmatmul.msk.f32.vlgmr.msra.gmra.mxu3 %vm116_vm0, %v103_v21 }
  0x23   :  { %225 = vmatpush.msra.mxu2 %v200_v24 }
  0x24   :  { %143 = vmatpush.msra.mxu0 %v105_v15 }
  0x25   :  { %226 = vmatpush.msra.mxu2 %v199_v26 }
  0x26   :  { %144 = vmatpush.msra.mxu0 %v104_v20  ;;  %2452 = vmatmul.msk.f32.vlgmr.msra.gmra.mxu2 %vm116_vm0, %v100_v19 }
  0x27   :  { %2444 = vmatmul.msk.f32.vlgmr.msra.gmra.mxu0 %vm116_vm0, %v100_v19 }
  0x29   :  { %2449 = vmatmul.msk.f32.gmra.mxu1 %vm116_vm0, %v101_v25 }
  0x2e   :  { %2453 = vmatmul.msk.f32.gmra.mxu2 %vm116_vm0, %v101_v25 }
  0x2f   :  { %2445 = vmatmul.msk.f32.gmra.mxu0 %vm116_vm0, %v101_v25 }
  0x31   :  { %2450 = vmatmul.msk.f32.gmra.mxu1 %vm116_vm0, %v102_v27 }
  0x36   :  { %2454 = vmatmul.msk.f32.gmra.mxu2 %vm116_vm0, %v102_v27 }
  0x37   :  { %2446 = vmatmul.msk.f32.gmra.mxu0 %vm116_vm0, %v102_v27  ;;  %v244_v27 = vlaneseq }
  0x3e   :  { %2455 = vmatmul.msk.f32.gmra.mxu2 %vm116_vm0, %v103_v21 }
  0x3f   :  { %2447 = vmatmul.msk.f32.gmra.mxu0 %vm116_vm0, %v103_v21 }
  0x9e   :  { %v187_v29 = vpop.f32.mrf.mxu1 }
  0x9f   :  { %v188_v31 = vadd.f32 %v2662_v28, %v187_v29 }
  0xa1   :  { %740 = vrot.lane.b32.xlu2 %v188_v31, %s2928_s5  ;;  %494 = vrot.lane.b32.xlu1 %v188_v31, %s2929_s0 }
  0xa2   :  { %330 = vrot.lane.b32.xlu0 %v188_v31, %s2930_s4 }
  0xa4   :  { %v146_v32 = vpop.f32.mrf.mxu0 }
  0xa5   :  { %v147_v33 = vadd.f32 %v2663_v30, %v146_v32  ;;  %v196_v37 = vpop.f32.mrf.mxu3  ;;  %v245_v32 = vshrl.u32 %v244_v27, 7 }
  0xa6   :  { %v190_v35 = vpop.f32.mrf.mxu1  ;;  %v3136_v38 = vadd.f32 %v2662_v28, %v196_v37 }
  0xa7   :  { %v240_v34 = vmul.f32 0.35355338, %v147_v33  ;;  %v191_v36 = vadd.f32 %v2662_v28, %v190_v35  ;;  %v246_v33 = vadd.s32 8, %v245_v32 }
  0xa9   :  { %2456 = vmatpush.xpose.msk.msrb.mxu3 %vm251_vm1, %v191_v36  ;;  %576 = vrot.lane.b32.xlu1 %v188_v31, %s2931_s18  ;;  %v228_v50 = vpop.f32.mrf.mxu2 }
  0xaa   :  { %412 = vrot.lane.b32.xlu0 %v188_v31, %s2932_s19  ;;  %654 = vrot.lane.b32.xlu2 %v240_v34, %s2933_s1  ;;  %v3185_v53 = vadd.f32 %v2664_v51, %v228_v50 }
  0xac   :  { %v149_v39 = vpop.f32.mrf.mxu0 }
  0xad   :  { %2457 = vmatpush.xpose.msk.msrb.mxu3 %vm251_vm1, %v188_v31  ;;  %v150_v40 = vadd.f32 %v2663_v30, %v149_v39 }
  0xae   :  { %v193_v42 = vpop.f32.mrf.mxu1 }
  0xaf   :  { %v241_v41 = vmul.f32 0.35355338, %v150_v40  ;;  %v194_v44 = vadd.f32 %v2662_v28, %v193_v42 }
  0xb0   :  { %2458 = vmatmul.msk.f32.vlgmr.msrb.gmra.mxu3 %vm251_vm1, %v240_v34 }
  0xb1   :  { %2460 = vmatpush.xpose.msk.msra.mxu3 %vm251_vm1, %v3136_v38  ;;  %326 = vrot.lane.b32.xlu1 %v240_v34, %s2930_s4  ;;  %v231_v52 = vpop.f32.mrf.mxu2 }
  0xb2   :  { %658 = vrot.lane.b32.xlu0 %v188_v31, %s2933_s1  ;;  %818 = vrot.lane.b32.xlu2 %v240_v34, %s2934_s2  ;;  %v3187_v54 = vadd.f32 %v2664_v51, %v231_v52 }
  0xb4   :  { %v152_v43 = vpop.f32.mrf.mxu0  ;;  %v3191_v55 = vpack.i.bf16 %v3185_v53, %v3187_v54 }
  0xb5   :  { %v153_v45 = vadd.f32 %v2663_v30, %v152_v43  ;;  %2461 = vmatpush.xpose.msk.msra.mxu3 %vm251_vm1, %v194_v44 }
  0xb7   :  { %v3155_v46 = vmul.f32 0.35355338, %v153_v45 }
  0xb8   :  { %2459 = vmatmul.msk.f32.gmra.mxu3 %vm251_vm1, %v241_v41 }
  0xb9   :  { %408 = vrot.lane.b32.xlu1 %v240_v34, %s2932_s19  ;;  %v234_v4 = vpop.f32.mrf.mxu2 }
  0xba   :  { %822 = vrot.lane.b32.xlu0 %v188_v31, %s2934_s2  ;;  %371 = vrot.lane.b32.xlu2 %v3136_v38, %s2930_s4  ;;  %v3252_v9 = vadd.f32 %v2664_v51, %v234_v4 }
  0xbc   :  { %v155_v47 = vpop.f32.mrf.mxu0 }
  0xbd   :  { %v156_v48 = vadd.f32 %v2663_v30, %v155_v47 }
  0xbf   :  { %v3167_v49 = vmul.f32 0.35355338, %v156_v48 }
  0xc0   :  { %2462 = vmatmul.msk.f32.vlgmr.msra.gmra.mxu3 %vm251_vm1, %v3155_v46 }
  0xc1   :  { %453 = vrot.lane.b32.xlu1 %v3136_v38, %s2932_s19  ;;  %v237_v8 = vpop.f32.mrf.mxu2 }
  0xc2   :  { %535 = vrot.lane.b32.xlu2 %v3136_v38, %s2929_s0  ;;  %490 = vrot.lane.b32.xlu0 %v240_v34, %s2929_s0  ;;  %v3258_v10 = vadd.f32 %v2664_v51, %v237_v8 }
  0xc4   :  { %v3268_v14 = vpack.i.bf16 %v3252_v9, %v3258_v10 }
  0xc8   :  { %2463 = vmatmul.msk.f32.gmra.mxu3 %vm251_vm1, %v3167_v49 }
  0xc9   :  { %414 = vrot.lane.b32.xlu1 %v191_v36, %s2932_s19 }
  0xca   :  { %617 = vrot.lane.b32.xlu2 %v3136_v38, %s2931_s18  ;;  %572 = vrot.lane.b32.xlu0 %v240_v34, %s2931_s18 }
  0xd1   :  { %578 = vrot.lane.b32.xlu1 %v191_v36, %s2931_s18 }
  0xd2   :  { %496 = vrot.lane.b32.xlu2 %v191_v36, %s2929_s0  ;;  %736 = vrot.lane.b32.xlu0 %v240_v34, %s2928_s5  ;;  %v248_v34 = vand.u32 127, %v244_v27 }
  0xd4   :  { %vm3324_vm2 = vcmp.le.s32.totalorder %v248_v34, %v246_v33  ;;  %vm3339_vm4 = vcmp.le.s32.totalorder %v248_v34, %v245_v32 }
  0xd9   :  { %328 = vrot.lane.b32.xlu1 %v241_v41, %s2930_s4 }
  0xda   :  { %824 = vrot.lane.b32.xlu2 %v191_v36, %s2934_s2  ;;  %699 = vrot.lane.b32.xlu0 %v3136_v38, %s2933_s1 }
  0xe1   :  { %820 = vrot.lane.b32.xlu1 %v241_v41, %s2934_s2 }
  0xe2   :  { %742 = vrot.lane.b32.xlu2 %v191_v36, %s2928_s5  ;;  %781 = vrot.lane.b32.xlu0 %v3136_v38, %s2928_s5 }
  0xe9   :  { %738 = vrot.lane.b32.xlu1 %v241_v41, %s2928_s5 }
  0xea   :  { %492 = vrot.lane.b32.xlu2 %v241_v41, %s2929_s0  ;;  %332 = vrot.lane.b32.xlu0 %v191_v36, %s2930_s4 }
  0xf1   :  { %2598 = vrot.lane.b32.xlu1 %v3191_v55, %s2929_s0 }
  0xf2   :  { %2593 = vrot.lane.b32.xlu2 %v3191_v55, %s2930_s4  ;;  %660 = vrot.lane.b32.xlu0 %v191_v36, %s2933_s1 }
  0xf9   :  { %533 = vrot.lane.b32.xlu1 %v194_v44, %s2929_s0 }
  0xfa   :  { %451 = vrot.lane.b32.xlu2 %v194_v44, %s2932_s19  ;;  %410 = vrot.lane.b32.xlu0 %v241_v41, %s2932_s19 }
  0xfb   :  { %v3201_v56 = vpop.permute.xlu2 %740 }
 0x101   :  { %447 = vrot.lane.b32.xlu1 %v3155_v46, %s2932_s19 }
 0x102   :  { %615 = vrot.lane.b32.xlu2 %v194_v44, %s2931_s18  ;;  %656 = vrot.lane.b32.xlu0 %v241_v41, %s2933_s1 }
 0x104   :  { %v3207_v57 = vpop.permute.xlu2 %654 }
 0x109   :  { %529 = vrot.lane.b32.xlu1 %v3155_v46, %s2929_s0 }
 0x10a   :  { %697 = vrot.lane.b32.xlu2 %v194_v44, %s2933_s1  ;;  %574 = vrot.lane.b32.xlu0 %v241_v41, %s2931_s18 }
 0x10c   :  { %v3213_v58 = vpop.permute.xlu2 %818 }
 0x111   :  { %611 = vrot.lane.b32.xlu1 %v3155_v46, %s2931_s18 }
 0x112   :  { %779 = vrot.lane.b32.xlu2 %v194_v44, %s2928_s5  ;;  %369 = vrot.lane.b32.xlu0 %v194_v44, %s2930_s4 }
 0x113   :  { %v3219_v59 = vpop.permute.xlu1 %494 }
 0x114   :  { %v3221_v60 = vpop.permute.xlu0 %330  ;;  %v372_v61 = vpop.permute.xlu2 %371 }
 0x115   :  { %2468 = vmatpush.xpose.msk.msrb.mxu2 %vm251_vm1, %v372_v61 }
 0x119   :  { %693 = vrot.lane.b32.xlu1 %v3155_v46, %s2933_s1 }
 0x11a   :  { %861 = vrot.lane.b32.xlu2 %v194_v44, %s2934_s2  ;;  %863 = vrot.lane.b32.xlu0 %v3136_v38, %s2934_s2 }
 0x11b   :  { %v577_v62 = vpop.permute.xlu1 %576 }
 0x11c   :  { %v413_v63 = vpop.permute.xlu0 %412  ;;  %v536_v0 = vpop.permute.xlu2 %535 }
 0x11d   :  { %2484 = vmatpush.xpose.msk.msrb.mxu0 %vm251_vm1, %v536_v0 }
 0x121   :  { %531 = vrot.lane.b32.xlu1 %v3167_v49, %s2929_s0 }
 0x122   :  { %365 = vrot.lane.b32.xlu2 %v3155_v46, %s2930_s4  ;;  %775 = vrot.lane.b32.xlu0 %v3155_v46, %s2928_s5 }
 0x123   :  { %v3236_v1 = vpop.permute.xlu1 %326 }
 0x124   :  { %v3238_v2 = vpop.permute.xlu0 %658  ;;  %v3240_v3 = vpop.permute.xlu2 %617 }
 0x129   :  { %613 = vrot.lane.b32.xlu1 %v3167_v49, %s2931_s18 }
 0x12a   :  { %367 = vrot.lane.b32.xlu2 %v3167_v49, %s2930_s4  ;;  %857 = vrot.lane.b32.xlu0 %v3155_v46, %s2934_s2 }
 0x12b   :  { %v409_v5 = vpop.permute.xlu1 %408 }
 0x12c   :  { %v3248_v6 = vpop.permute.xlu0 %822  ;;  %v497_v7 = vpop.permute.xlu2 %496 }
 0x131   :  { %777 = vrot.lane.b32.xlu1 %v3167_v49, %s2928_s5 }
 0x132   :  { %695 = vrot.lane.b32.xlu2 %v3167_v49, %s2933_s1  ;;  %449 = vrot.lane.b32.xlu0 %v3167_v49, %s2932_s19 }
 0x133   :  { %v3260_v11 = vpop.permute.xlu1 %453  ;;  %v281_v28 = vpop.f32.mrf.mxu3 }
 0x134   :  { %v3262_v12 = vpop.permute.xlu2 %824  ;;  %v3264_v13 = vpop.permute.xlu0 %490  ;;  %v3363_v51 = vsel %vm3339_vm4, %v281_v28, -1e+30 }
 0x139   :  { %859 = vrot.lane.b32.xlu1 %v3167_v49, %s2934_s2 }
 0x13a   :  { %2613 = vrot.lane.b32.xlu2 %v3268_v14, %s2932_s19  ;;  %2603 = vrot.lane.b32.xlu0 %v3191_v55, %s2932_s19 }
 0x13b   :  { %v415_v15 = vpop.permute.xlu1 %414  ;;  %v284_v35 = vpop.f32.mrf.mxu3 }
 0x13c   :  { %v743_v16 = vpop.permute.xlu2 %742  ;;  %v3276_v17 = vpop.permute.xlu0 %572  ;;  %2472 = vmatpush.xpose.msk.msrb.mxu1 %vm251_vm1, %v415_v15  ;;  %v3333_v40 = vsel %vm3324_vm2, %v284_v35, -1e+30 }
 0x13d   :  { %v904_v41 = vsel %vm900_vm3, %v3333_v40, -inf }
 0x140   :  { %2473 = vmatpush.xpose.msk.msrb.mxu1 %vm251_vm1, %v413_v63 }
 0x141   :  { %2608 = vrot.lane.b32.xlu1 %v3268_v14, %s2930_s4 }
 0x142   :  { %2618 = vrot.lane.b32.xlu2 %v3191_v55, %s2933_s1  ;;  %2623 = vrot.lane.b32.xlu0 %v3191_v55, %s2931_s18 }
 0x143   :  { %2474 = vmatmul.msk.f32.vlgmr.msrb.gmra.mxu1 %vm251_vm1, %v409_v5  ;;  %v579_v18 = vpop.permute.xlu1 %578  ;;  %v316_v42 = vpop.f32.mrf.mxu3 }
 0x144   :  { %v3287_v19 = vpop.permute.xlu2 %492  ;;  %v3289_v20 = vpop.permute.xlu0 %736  ;;  %2488 = vmatpush.xpose.msk.msra.mxu1 %vm251_vm1, %v579_v18  ;;  %v3349_v46 = vsel %vm3339_vm4, %v316_v42, -1e+30 }
 0x145   :  { %v949_v47 = vsel %vm900_vm3, %v3349_v46, -inf }
 0x148   :  { %2489 = vmatpush.xpose.msk.msra.mxu1 %vm251_vm1, %v577_v62 }
 0x149   :  { %2628 = vrot.lane.b32.xlu1 %v3268_v14, %s2929_s0 }
 0x14a   :  { %2633 = vrot.lane.b32.xlu0 %v3268_v14, %s2931_s18 }
 0x14b   :  { %v329_v21 = vpop.permute.xlu1 %328  ;;  %v319_v52 = vpop.f32.mrf.mxu3 }
 0x14c   :  { %2504 = vmatpush.xpose.msk.msrb.mxu1 %vm251_vm1, %v743_v16  ;;  %v3298_v22 = vpop.permute.xlu2 %2593  ;;  %v700_v23 = vpop.permute.xlu0 %699 }
 0x14d   :  { %v2595_v61 = vunpack.i.l.bf16 %v3298_v22  ;;  %v2596_v0 = vunpack.i.h.bf16 %v3298_v22 }
 0x150   :  { %2505 = vmatpush.xpose.msk.msrb.mxu1 %vm251_vm1, %v3201_v56 }
 0x151   :  { %2638 = vrot.lane.b32.xlu1 %v3191_v55, %s2934_s2 }
 0x152   :  { %2643 = vrot.lane.b32.xlu0 %v3191_v55, %s2928_s5 }
 0x153   :  { %v3306_v24 = vpop.permute.xlu1 %820 }
 0x154   :  { %v3308_v25 = vpop.permute.xlu2 %451  ;;  %v3310_v26 = vpop.permute.xlu0 %781 }
 0x15b   :  { %v3312_v29 = vpop.permute.xlu1 %738 }
 0x15c   :  { %v333_v30 = vpop.permute.xlu0 %332  ;;  %v3314_v31 = vpop.permute.xlu2 %615 }
 0x15d   :  { %2464 = vmatpush.xpose.msk.msrb.mxu3 %vm251_vm1, %v333_v30 }
 0x161   :  { %2465 = vmatpush.xpose.msk.msrb.mxu3 %vm251_vm1, %v3221_v60 }
 0x163   :  { %v3320_v36 = vpop.permute.xlu1 %2598 }
 0x164   :  { %v661_v37 = vpop.permute.xlu0 %660  ;;  %2466 = vmatmul.msk.f32.vlgmr.msrb.gmra.mxu3 %vm251_vm1, %v3236_v1  ;;  %v698_v39 = vpop.permute.xlu2 %697  ;;  %v2600_v5 = vunpack.i.l.bf16 %v3320_v36 }
 0x165   :  { %2480 = vmatpush.xpose.msk.msra.mxu3 %vm251_vm1, %v497_v7  ;;  %v2601_v7 = vunpack.i.h.bf16 %v3320_v36 }
 0x169   :  { %2481 = vmatpush.xpose.msk.msra.mxu3 %vm251_vm1, %v3219_v59  ;;  %v901_v59 = vsel %vm900_vm3, %v3363_v51, -inf }
 0x16b   :  { %905 = vmax.xlane.f32.xlu2 %v904_v41  ;;  %v534_v43 = vpop.permute.xlu1 %533 }
 0x16c   :  { %v411_v45 = vpop.permute.xlu0 %410  ;;  %2467 = vmatmul.msk.f32.gmra.mxu3 %vm251_vm1, %v329_v21  ;;  %2485 = vmatpush.xpose.msk.msrb.mxu0 %vm251_vm1, %v534_v43  ;;  %v780_v48 = vpop.permute.xlu2 %779 }
 0x16d   :  { %2496 = vmatpush.xpose.msk.msrb.mxu3 %vm251_vm1, %v661_v37  ;;  %2475 = vmatmul.msk.f32.gmra.mxu1 %vm251_vm1, %v411_v45 }
 0x170   :  { %2500 = vmatpush.xpose.msk.msra.mxu0 %vm251_vm1, %v700_v23 }
 0x171   :  { %2497 = vmatpush.xpose.msk.msrb.mxu3 %vm251_vm1, %v3238_v2 }
 0x173   :  { %950 = vmax.xlane.f32.xlu2 %v949_v47  ;;  %v448_v49 = vpop.permute.xlu1 %447 }
 0x174   :  { %2501 = vmatpush.xpose.msk.msra.mxu0 %vm251_vm1, %v698_v39  ;;  %v657_v50 = vpop.permute.xlu0 %656  ;;  %2482 = vmatmul.msk.f32.vlgmr.msra.gmra.mxu3 %vm251_vm1, %v3264_v13  ;;  %v862_v55 = vpop.permute.xlu2 %861 }
 0x175   :  { %2512 = vmatpush.xpose.msk.msra.mxu3 %vm251_vm1, %v3262_v12  ;;  %2490 = vmatmul.msk.f32.vlgmr.msra.gmra.mxu1 %vm251_vm1, %v3276_v17 }
 0x176   :  { %1273 = vmatpush.msra.mxu1 %v3187_v54 }
 0x178   :  { %1274 = vmatpush.msra.mxu1 %v3185_v53  ;;  %v3376_v53 = vsel %vm3324_vm2, %v319_v52, -1e+30 }
 0x179   :  { %2513 = vmatpush.xpose.msk.msra.mxu3 %vm251_vm1, %v3248_v6  ;;  %v952_v54 = vsel %vm900_vm3, %v3376_v53, -inf }
 0x17b   :  { %v530_v56 = vpop.permute.xlu1 %529 }
 0x17c   :  { %v575_v60 = vpop.permute.xlu0 %574  ;;  %2483 = vmatmul.msk.f32.gmra.mxu3 %vm251_vm1, %v3287_v19  ;;  %902 = vmax.xlane.f32.xlu0 %v901_v59  ;;  %v366_v1 = vpop.permute.xlu2 %365 }
 0x17d   :  { %2486 = vmatmul.msk.f32.vlgmr.msrb.gmra.mxu0 %vm251_vm1, %v530_v56  ;;  %2491 = vmatmul.msk.f32.gmra.mxu1 %vm251_vm1, %v575_v60 }
 0x183   :  { %v612_v62 = vpop.permute.xlu1 %611 }
 0x184   :  { %v370_v63 = vpop.permute.xlu0 %369  ;;  %2498 = vmatmul.msk.f32.vlgmr.msrb.gmra.mxu3 %vm251_vm1, %v3207_v57  ;;  %953 = vmax.xlane.f32.xlu0 %v952_v54  ;;  %v368_v4 = vpop.permute.xlu2 %367 }
 0x185   :  { %1339 = vmatpush.msrb.mxu3 %v2595_v61  ;;  %2469 = vmatpush.xpose.msk.msrb.mxu2 %vm251_vm1, %v370_v63 }
 0x186   :  { %2506 = vmatmul.msk.f32.vlgmr.msrb.gmra.mxu1 %vm251_vm1, %v3289_v20 }
 0x187   :  { %1340 = vmatpush.msrb.mxu3 %v2596_v0 }
 0x188   :  { %2470 = vmatmul.msk.f32.vlgmr.msrb.gmra.mxu2 %vm251_vm1, %v366_v1 }
 0x189   :  { %2476 = vmatpush.xpose.msk.msra.mxu2 %vm251_vm1, %v3260_v11 }
 0x18b   :  { %v694_v57 = vpop.permute.xlu1 %693 }
 0x18c   :  { %v864_v2 = vpop.permute.xlu0 %863  ;;  %2499 = vmatmul.msk.f32.gmra.mxu3 %vm251_vm1, %v657_v50 }
 0x18d   :  { %2477 = vmatpush.xpose.msk.msra.mxu2 %vm251_vm1, %v3308_v25  ;;  %2516 = vmatpush.xpose.msk.msrb.mxu0 %vm251_vm1, %v864_v2 }
 0x18e   :  { %2507 = vmatmul.msk.f32.gmra.mxu1 %vm251_vm1, %v3312_v29 }
 0x190   :  { %2471 = vmatmul.msk.f32.gmra.mxu2 %vm251_vm1, %v368_v4 }
 0x191   :  { %2492 = vmatpush.xpose.msk.msrb.mxu2 %vm251_vm1, %v3240_v3  ;;  %2517 = vmatpush.xpose.msk.msrb.mxu0 %vm251_vm1, %v862_v55 }
 0x193   :  { %v532_v3 = vpop.permute.xlu1 %531 }
 0x194   :  { %v776_v6 = vpop.permute.xlu0 %775  ;;  %2514 = vmatmul.msk.f32.vlgmr.msra.gmra.mxu3 %vm251_vm1, %v3213_v58  ;;  %2487 = vmatmul.msk.f32.gmra.mxu0 %vm251_vm1, %v532_v3  ;;  %v696_v58 = vpop.permute.xlu2 %695 }
 0x195   :  { %2493 = vmatpush.xpose.msk.msrb.mxu2 %vm251_vm1, %v3314_v31  ;;  %1481 = vmatpush.msra.mxu3 %v2600_v5 }
 0x197   :  { %1482 = vmatpush.msra.mxu3 %v2601_v7 }
 0x198   :  { %2478 = vmatmul.msk.f32.vlgmr.msra.gmra.mxu2 %vm251_vm1, %v448_v49 }
 0x199   :  { %2508 = vmatpush.xpose.msk.msra.mxu2 %vm251_vm1, %v3310_v26 }
 0x19b   :  { %v614_v8 = vpop.permute.xlu1 %613 }
 0x19c   :  { %v858_v11 = vpop.permute.xlu0 %857  ;;  %2515 = vmatmul.msk.f32.gmra.mxu3 %vm251_vm1, %v3306_v24  ;;  %2502 = vmatmul.msk.f32.vlgmr.msra.gmra.mxu0 %vm251_vm1, %v694_v57  ;;  %v2614_v22 = vpop.permute.xlu2 %2613 }
 0x19d   :  { %2509 = vmatpush.xpose.msk.msra.mxu2 %vm251_vm1, %v780_v48  ;;  %v2615_v24 = vunpack.i.l.bf16 %v2614_v22 }
 0x1a3   :  { %v778_v12 = vpop.permute.xlu1 %777 }
 0x1a4   :  { %v450_v13 = vpop.permute.xlu0 %449  ;;  %2503 = vmatmul.msk.f32.gmra.mxu0 %vm251_vm1, %v696_v58  ;;  %v3469_v59 = vpop.permute.xlu2 %2618 }
 0x1a5   :  { %2479 = vmatmul.msk.f32.gmra.mxu2 %vm251_vm1, %v450_v13 }
 0x1ab   :  { %v860_v15 = vpop.permute.xlu1 %859 }
 0x1ac   :  { %v2604_v16 = vpop.permute.xlu0 %2603  ;;  %2518 = vmatmul.msk.f32.vlgmr.msrb.gmra.mxu0 %vm251_vm1, %v858_v11 }
 0x1ad   :  { %v2605_v17 = vunpack.i.l.bf16 %v2604_v16  ;;  %2494 = vmatmul.msk.f32.vlgmr.msrb.gmra.mxu2 %vm251_vm1, %v612_v62  ;;  %v2606_v18 = vunpack.i.h.bf16 %v2604_v16 }
 0x1ae   :  { %1302 = vmatpush.msrb.mxu2 %v3258_v10  ;;  %v2616_v10 = vunpack.i.h.bf16 %v2614_v22 }
 0x1af   :  { %1411 = vmatpush.msrb.mxu1 %v2605_v17 }
 0x1b0   :  { %1303 = vmatpush.msrb.mxu2 %v3252_v9 }
 0x1b1   :  { %1412 = vmatpush.msrb.mxu1 %v2606_v18 }
 0x1b3   :  { %v2609_v19 = vpop.permute.xlu1 %2608 }
 0x1b4   :  { %v2611_v20 = vunpack.i.h.bf16 %v2609_v19  ;;  %v2610_v21 = vunpack.i.l.bf16 %v2609_v19  ;;  %2519 = vmatmul.msk.f32.gmra.mxu0 %vm251_vm1, %v860_v15  ;;  %v3430_v29 = vpop.permute.xlu0 %2623 }
 0x1b5   :  { %2495 = vmatmul.msk.f32.gmra.mxu2 %vm251_vm1, %v614_v8 }
 0x1b6   :  { %1376 = vmatpush.msra.mxu0 %v2610_v21 }
 0x1b8   :  { %1377 = vmatpush.msra.mxu0 %v2611_v20 }
 0x1bb   :  { %v2629_v23 = vpop.permute.xlu1 %2628 }
 0x1bc   :  { %v2631_v25 = vunpack.i.h.bf16 %v2629_v23  ;;  %v2630_v26 = vunpack.i.l.bf16 %v2629_v23  ;;  %v3432_v30 = vpop.permute.xlu0 %2633 }
 0x1bd   :  { %2510 = vmatmul.msk.f32.vlgmr.msra.gmra.mxu2 %vm251_vm1, %v776_v6 }
 0x1be   :  { %1446 = vmatpush.msra.mxu2 %v2615_v24  ;;  %1516 = vmatpush.msrb.mxu0 %v2630_v26 }
 0x1c0   :  { %v441_v9 = vpop.f32.mrf.mxu1  ;;  %1447 = vmatpush.msra.mxu2 %v2616_v10  ;;  %1517 = vmatpush.msrb.mxu0 %v2631_v25 }
 0x1c1   :  { %v3425_v27 = vsel %vm3339_vm4, %v441_v9, -1e+30 }
 0x1c2   :  { %v913_v28 = vsel %vm900_vm3, %v3425_v27, -inf }
 0x1c3   :  { %914 = vmax.xlane.f32.xlu1 %v913_v28 }
 0x1c4   :  { %v3444_v36 = vpop.permute.xlu0 %2643 }
 0x1c5   :  { %2511 = vmatmul.msk.f32.gmra.mxu2 %vm251_vm1, %v778_v12 }
 0x1de   :  { %v906_v63 = vpop.xlane.xlu2 %905 }
 0x1df   :  { %v998_v4 = vsub.f32 %v3333_v40, %v906_v63 }
 0x1e1   :  { %v1031_v7 = vmul.f32 1.442695, %v998_v4 }
 0x1e6   :  { %v951_v21 = vpop.xlane.xlu2 %950 }
 0x1e7   :  { %v359_v31 = vpop.f32.mrf.mxu3  ;;  %v1013_v26 = vsub.f32 %v3349_v46, %v951_v21 }
 0x1e8   :  { %v3436_v32 = vsel %vm3339_vm4, %v359_v31, -1e+30 }
 0x1e9   :  { %v907_v33 = vsel %vm900_vm3, %v3436_v32, -inf }
 0x1ea   :  { %v444_v34 = vpop.f32.mrf.mxu1  ;;  %908 = vmax.xlane.f32.xlu2 %v907_v33 }
 0x1eb   :  { %v3442_v35 = vsel %vm3324_vm2, %v444_v34, -1e+30  ;;  %v1061_v34 = vmul.f32 1.442695, %v1013_v26 }
 0x1ec   :  { %v916_v37 = vsel %vm900_vm3, %v3442_v35, -inf }
 0x1ef   :  { %v903_v43 = vpop.xlane.xlu0 %902  ;;  %v362_v50 = vpop.f32.mrf.mxu3 }
 0x1f0   :  { %v997_v47 = vsub.f32 %v3363_v51, %v903_v43  ;;  %v3463_v55 = vsel %vm3324_vm2, %v362_v50, -1e+30 }
 0x1f1   :  { %v910_v56 = vsel %vm900_vm3, %v3463_v55, -inf }
 0x1f2   :  { %v605_v39 = vpop.f32.mrf.mxu1  ;;  %917 = vmax.xlane.f32.xlu2 %v916_v37  ;;  %v1029_v52 = vmul.f32 1.442695, %v997_v47 }
 0x1f3   :  { %v3450_v41 = vsel %vm3339_vm4, %v605_v39, -1e+30 }
 0x1f4   :  { %v925_v42 = vsel %vm900_vm3, %v3450_v41, -inf  ;;  %2671 = vpow2.f32 %v1029_v52 }
 0x1f5   :  { %926 = vmax.xlane.f32.xlu0 %v925_v42  ;;  %2673 = vpow2.f32 %v1031_v7 }
 0x1f6   :  { %2675 = vpow2.f32 %v1061_v34 }
 0x1f7   :  { %v523_v6 = vpop.f32.mrf.mxu3 }
 0x1f8   :  { %v3494_v11 = vsel %vm3339_vm4, %v523_v6, -1e+30 }
 0x1f9   :  { %v919_v13 = vsel %vm900_vm3, %v3494_v11, -inf }
 0x1fa   :  { %v562_v45 = vpop.f32.mrf.mxu0  ;;  %v3467_v51 = vpop.eup %2671 }
 0x1fb   :  { %v3457_v48 = vsel %vm3339_vm4, %v562_v45, -1e+30  ;;  %v1093_v61 = vsel %vm900_vm3, %v3467_v51, 0.0  ;;  %v608_v12 = vpop.f32.mrf.mxu1  ;;  %v3508_v17 = vpop.eup %2673 }
 0x1fc   :  { %v967_v49 = vsel %vm900_vm3, %v3457_v48, -inf  ;;  %v3506_v15 = vsel %vm3324_vm2, %v608_v12, -1e+30  ;;  %v1096_v20 = vsel %vm900_vm3, %v3508_v17, 0.0  ;;  %v3551_v52 = vpop.eup %2675 }
 0x1fd   :  { %968 = vmax.xlane.f32.xlu1 %v967_v49  ;;  %v928_v19 = vsel %vm900_vm3, %v3506_v15, -inf }
 0x1ff   :  { %v526_v18 = vpop.f32.mrf.mxu3 }
 0x200   :  { %v3539_v39 = vsel %vm3324_vm2, %v526_v18, -1e+30 }
 0x201   :  { %v922_v47 = vsel %vm900_vm3, %v3539_v39, -inf }
 0x203   :  { %v769_v37 = vpop.f32.mrf.mxu1 }
 0x204   :  { %v3543_v43 = vsel %vm3339_vm4, %v769_v37, -1e+30 }
 0x205   :  { %911 = vmax.xlane.f32.xlu1 %v910_v56  ;;  %v937_v49 = vsel %vm900_vm3, %v3543_v43, -inf }
 0x207   :  { %v687_v31 = vpop.f32.mrf.mxu3 }
 0x208   :  { %v3535_v46 = vsel %vm3339_vm4, %v687_v31, -1e+30 }
 0x209   :  { %v931_v45 = vsel %vm900_vm3, %v3535_v46, -inf }
 0x20b   :  { %v398_v60 = vpop.f32.mrf.mxu2  ;;  %v772_v4 = vpop.f32.mrf.mxu1 }
 0x20c   :  { %v3473_v54 = vsel %vm3339_vm4, %v398_v60, -1e+30  ;;  %v954_v60 = vpop.xlane.xlu0 %953  ;;  %v3570_v7 = vsel %vm3324_vm2, %v772_v4, -1e+30 }
 0x20d   :  { %1094 = vadd.xlane.f32.xlu1 %v1093_v61  ;;  %v955_v62 = vsel %vm900_vm3, %v3473_v54, -inf }
 0x20e   :  { %956 = vmax.xlane.f32.xlu2 %v955_v62 }
 0x211   :  { %v565_v0 = vpop.f32.mrf.mxu0 }
 0x212   :  { %v3481_v1 = vsel %vm3324_vm2, %v565_v0, -1e+30  ;;  %v690_v0 = vpop.f32.mrf.mxu3 }
 0x213   :  { %v401_v57 = vpop.f32.mrf.mxu2  ;;  %v970_v2 = vsel %vm900_vm3, %v3481_v1, -inf  ;;  %v3610_v34 = vsel %vm3324_vm2, %v690_v0, -1e+30 }
 0x214   :  { %v3488_v5 = vsel %vm3324_vm2, %v401_v57, -1e+30  ;;  %v1141_v57 = vsel %vm900_vm3, %v3551_v52, 0.0 }
 0x215   :  { %v958_v3 = vsel %vm900_vm3, %v3488_v5, -inf }
 0x216   :  { %971 = vmax.xlane.f32.xlu2 %v970_v2  ;;  %959 = vmax.xlane.f32.xlu0 %v958_v3  ;;  %v1014_v2 = vsub.f32 %v3376_v53, %v954_v60 }
 0x218   :  { %v1063_v6 = vmul.f32 1.442695, %v1014_v2 }
 0x219   :  { %v726_v8 = vpop.f32.mrf.mxu0 }
 0x21a   :  { %v3498_v58 = vsel %vm3339_vm4, %v726_v8, -1e+30  ;;  %2677 = vpow2.f32 %v1063_v6  ;;  %v851_v53 = vpop.f32.mrf.mxu3 }
 0x21b   :  { %v979_v40 = vsel %vm900_vm3, %v3498_v58, -inf  ;;  %v480_v16 = vpop.f32.mrf.mxu2 }
 0x21c   :  { %980 = vmax.xlane.f32.xlu1 %v979_v40  ;;  %v3516_v23 = vsel %vm3339_vm4, %v480_v16, -1e+30  ;;  %v940_v40 = vsel %vm900_vm3, %v3570_v7, -inf }
 0x21d   :  { %v961_v28 = vsel %vm900_vm3, %v3516_v23, -inf }
 0x21e   :  { %920 = vmax.xlane.f32.xlu0 %v919_v13  ;;  %v3582_v13 = vsel %vm3339_vm4, %v851_v53, -1e+30 }
 0x220   :  { %v3584_v16 = vpop.eup %2677 }
 0x221   :  { %v729_v22 = vpop.f32.mrf.mxu0 }
 0x222   :  { %v3525_v10 = vsel %vm3324_vm2, %v729_v22, -1e+30 }
 0x223   :  { %v982_v33 = vsel %vm900_vm3, %v3525_v10, -inf }
 0x224   :  { %929 = vmax.xlane.f32.xlu1 %v928_v19  ;;  %v943_v19 = vsel %vm900_vm3, %v3582_v13, -inf }
 0x226   :  { %1097 = vadd.xlane.f32.xlu0 %v1096_v20  ;;  %v1144_v20 = vsel %vm900_vm3, %v3584_v16, 0.0 }
 0x228   :  { %v483_v24 = vpop.f32.mrf.mxu2 }
 0x229   :  { %v3520_v25 = vsel %vm3324_vm2, %v483_v24, -1e+30  ;;  %v890_v50 = vpop.f32.mrf.mxu0  ;;  %v3594_v24 = vpop.permute.xlu1 %2638 }
 0x22a   :  { %v964_v9 = vsel %vm900_vm3, %v3520_v25, -inf  ;;  %v3559_v62 = vsel %vm3339_vm4, %v890_v50, -1e+30 }
 0x22b   :  { %965 = vmax.xlane.f32.xlu2 %v964_v9  ;;  %v991_v3 = vsel %vm900_vm3, %v3559_v62, -inf }
 0x22c   :  { %962 = vmax.xlane.f32.xlu1 %v961_v28 }
 0x22e   :  { %983 = vmax.xlane.f32.xlu0 %v982_v33 }
 0x230   :  { %v644_v42 = vpop.f32.mrf.mxu2 }
 0x231   :  { %v3574_v8 = vsel %vm3339_vm4, %v644_v42, -1e+30  ;;  %v893_v21 = vpop.f32.mrf.mxu0 }
 0x232   :  { %v973_v12 = vsel %vm900_vm3, %v3574_v8, -inf  ;;  %v3598_v26 = vsel %vm3324_vm2, %v893_v21, -1e+30 }
 0x233   :  { %932 = vmax.xlane.f32.xlu2 %v931_v45  ;;  %v994_v31 = vsel %vm900_vm3, %v3598_v26, -inf  ;;  %v934_v45 = vsel %vm900_vm3, %v3610_v34, -inf }
 0x234   :  { %923 = vmax.xlane.f32.xlu1 %v922_v47  ;;  %v854_v47 = vpop.f32.mrf.mxu3 }
 0x235   :  { %v3619_v50 = vsel %vm3324_vm2, %v854_v47, -1e+30 }
 0x236   :  { %938 = vmax.xlane.f32.xlu0 %v937_v49  ;;  %v915_v33 = vpop.xlane.xlu1 %914 }
 0x237   :  { %v1001_v42 = vsub.f32 %v3425_v27, %v915_v33 }
 0x238   :  { %v647_v56 = vpop.f32.mrf.mxu2 }
 0x239   :  { %v3555_v61 = vsel %vm3324_vm2, %v647_v56, -1e+30  ;;  %v1037_v49 = vmul.f32 1.442695, %v1001_v42  ;;  %v946_v56 = vsel %vm900_vm3, %v3619_v50, -inf }
 0x23a   :  { %v976_v63 = vsel %vm900_vm3, %v3555_v61, -inf }
 0x23b   :  { %977 = vmax.xlane.f32.xlu2 %v976_v63  ;;  %2679 = vpow2.f32 %v1037_v49  ;;  %v2626_v49 = vunpack.i.h.bf16 %v3430_v29 }
 0x23c   :  { %1142 = vadd.xlane.f32.xlu1 %v1141_v57 }
 0x23e   :  { %992 = vmax.xlane.f32.xlu0 %v991_v3 }
 0x240   :  { %v808_v18 = vpop.f32.mrf.mxu2 }
 0x241   :  { %v3592_v22 = vsel %vm3339_vm4, %v808_v18, -1e+30  ;;  %v3623_v60 = vpop.eup %2679 }
 0x242   :  { %v985_v9 = vsel %vm900_vm3, %v3592_v22, -inf  ;;  %v1105_v27 = vsel %vm900_vm3, %v3623_v60, 0.0 }
 0x244   :  { %941 = vmax.xlane.f32.xlu1 %v940_v40 }
 0x246   :  { %974 = vmax.xlane.f32.xlu0 %v973_v12 }
 0x248   :  { %v811_v28 = vpop.f32.mrf.mxu2 }
 0x249   :  { %v3606_v44 = vsel %vm3324_vm2, %v811_v28, -1e+30 }
 0x24a   :  { %v988_v37 = vsel %vm900_vm3, %v3606_v44, -inf }
 0x24c   :  { %944 = vmax.xlane.f32.xlu1 %v943_v19 }
 0x24e   :  { %1145 = vadd.xlane.f32.xlu0 %v1144_v20 }
 0x254   :  { %986 = vmax.xlane.f32.xlu1 %v985_v9 }
 0x256   :  { %995 = vmax.xlane.f32.xlu0 %v994_v31 }
 0x25c   :  { %989 = vmax.xlane.f32.xlu1 %v988_v37  ;;  %v2625_v37 = vunpack.i.l.bf16 %v3430_v29 }
 0x25d   :  { %v909_v63 = vpop.xlane.xlu2 %908 }
 0x25e   :  { %935 = vmax.xlane.f32.xlu0 %v934_v45  ;;  %v999_v2 = vsub.f32 %v3436_v32, %v909_v63 }
 0x260   :  { %v1033_v4 = vmul.f32 1.442695, %v999_v2 }
 0x265   :  { %v918_v3 = vpop.xlane.xlu2 %917 }
 0x266   :  { %947 = vmax.xlane.f32.xlu0 %v946_v56  ;;  %v1002_v53 = vsub.f32 %v3442_v35, %v918_v3 }
 0x268   :  { %v1039_v18 = vmul.f32 1.442695, %v1002_v53 }
 0x26e   :  { %1106 = vadd.xlane.f32.xlu0 %v1105_v27 }
 0x270   :  { %v969_v0 = vpop.xlane.xlu1 %968 }
 0x271   :  { %v1019_v57 = vsub.f32 %v3457_v48, %v969_v0  ;;  %v927_v48 = vpop.xlane.xlu0 %926 }
 0x273   :  { %v1073_v38 = vmul.f32 1.442695, %v1019_v57 }
 0x275   :  { %2681 = vpow2.f32 %v1073_v38 }
 0x276   :  { %2683 = vpow2.f32 %v1033_v4  ;;  %v1005_v4 = vsub.f32 %v3450_v41, %v927_v48 }
 0x278   :  { %v912_v6 = vpop.xlane.xlu1 %911 }
 0x279   :  { %v1000_v56 = vsub.f32 %v3463_v55, %v912_v6 }
 0x27b   :  { %v3629_v40 = vpop.eup %2681 }
 0x27c   :  { %v1159_v12 = vsel %vm900_vm3, %v3629_v40, 0.0  ;;  %v3634_v20 = vpop.eup %2683 }
 0x27d   :  { %1160 = vadd.xlane.f32.xlu2 %v1159_v12  ;;  %v1099_v28 = vsel %vm900_vm3, %v3634_v20, 0.0 }
 0x280   :  { %v1095_v19 = vpop.xlane.xlu1 %1094 }
 0x281   :  { %2685 = vrcp.f32 %v1095_v19  ;;  %v957_v32 = vpop.xlane.xlu2 %956 }
 0x282   :  { %v1015_v21 = vsub.f32 %v3473_v54, %v957_v32  ;;  %2687 = vpow2.f32 %v1039_v18  ;;  %v1045_v18 = vmul.f32 1.442695, %v1005_v4 }
 0x284   :  { %v1065_v9 = vmul.f32 1.442695, %v1015_v21 }
 0x285   :  { %1100 = vadd.xlane.f32.xlu2 %v1099_v28 }
 0x286   :  { %2689 = vpow2.f32 %v1065_v9 }
 0x287   :  { %v2686_v35 = vpop.eup %2685 }
 0x288   :  { %v1221_v31 = vmul.f32 %v2686_v35, %v3467_v51  ;;  %v3640_v33 = vpop.eup %2687 }
 0x289   :  { %v972_v42 = vpop.xlane.xlu2 %971  ;;  %v960_v45 = vpop.xlane.xlu0 %959  ;;  %v1108_v0 = vsel %vm900_vm3, %v3640_v33, 0.0 }
 0x28a   :  { %v1020_v47 = vsub.f32 %v3481_v1, %v972_v42  ;;  %v1016_v54 = vsub.f32 %v3488_v5, %v960_v45  ;;  %2520 = vmatmul.msk.f32.vlgmr.msra.gmra.mxu1 %vm900_vm3, %v1221_v31  ;;  %v1035_v5 = vmul.f32 1.442695, %v1000_v56 }
 0x28b   :  { %1551 = vmatpush.msra.mxu1 %v2625_v37 }
 0x28c   :  { %v3648_v27 = vpop.eup %2689  ;;  %v1075_v51 = vmul.f32 1.442695, %v1020_v47  ;;  %v1067_v63 = vmul.f32 1.442695, %v1016_v54 }
 0x28d   :  { %1552 = vmatpush.msra.mxu1 %v2626_v49  ;;  %1109 = vadd.xlane.f32.xlu2 %v1108_v0  ;;  %v1147_v1 = vsel %vm900_vm3, %v3648_v27, 0.0 }
 0x28e   :  { %2691 = vpow2.f32 %v1075_v51  ;;  %1148 = vadd.xlane.f32.xlu1 %v1147_v1 }
 0x28f   :  { %2693 = vpow2.f32 %v1067_v63  ;;  %v981_v29 = vpop.xlane.xlu1 %980 }
 0x290   :  { %v1023_v55 = vsub.f32 %v3498_v58, %v981_v29  ;;  %2695 = vpow2.f32 %v1035_v5 }
 0x291   :  { %v921_v57 = vpop.xlane.xlu0 %920 }
 0x292   :  { %v1081_v2 = vmul.f32 1.442695, %v1023_v55  ;;  %v1003_v6 = vsub.f32 %v3494_v11, %v921_v57 }
 0x294   :  { %v3655_v38 = vpop.eup %2691  ;;  %2697 = vpow2.f32 %v1081_v2  ;;  %v1041_v32 = vmul.f32 1.442695, %v1003_v6 }
 0x295   :  { %v3658_v3 = vpop.eup %2693  ;;  %v1162_v53 = vsel %vm900_vm3, %v3655_v38, 0.0 }
 0x296   :  { %1163 = vadd.xlane.f32.xlu0 %v1162_v53  ;;  %v1150_v12 = vsel %vm900_vm3, %v3658_v3, 0.0  ;;  %v3665_v19 = vpop.eup %2695 }
 0x297   :  { %1151 = vadd.xlane.f32.xlu2 %v1150_v12  ;;  %v930_v58 = vpop.xlane.xlu1 %929  ;;  %v1102_v9 = vsel %vm900_vm3, %v3665_v19, 0.0 }
 0x298   :  { %v1006_v48 = vsub.f32 %v3506_v15, %v930_v58 }
 0x299   :  { %v1098_v21 = vpop.xlane.xlu0 %1097 }
 0x29a   :  { %v3667_v41 = vpop.eup %2697  ;;  %2699 = vrcp.f32 %v1098_v21  ;;  %v1047_v42 = vmul.f32 1.442695, %v1006_v48 }
 0x29b   :  { %2701 = vpow2.f32 %v1045_v18  ;;  %v1171_v11 = vsel %vm900_vm3, %v3667_v41, 0.0 }
 0x29c   :  { %2703 = vpow2.f32 %v1041_v32 }
 0x29e   :  { %1103 = vadd.xlane.f32.xlu0 %v1102_v9  ;;  %v966_v28 = vpop.xlane.xlu2 %965 }
 0x29f   :  { %1172 = vadd.xlane.f32.xlu2 %v1171_v11  ;;  %v963_v35 = vpop.xlane.xlu1 %962  ;;  %v1018_v49 = vsub.f32 %v3520_v25, %v966_v28 }
 0x2a0   :  { %v2700_v31 = vpop.eup %2699  ;;  %v1017_v37 = vsub.f32 %v3516_v23, %v963_v35  ;;  %v2635_v35 = vunpack.i.l.bf16 %v3432_v30 }
 0x2a1   :  { %v984_v45 = vpop.xlane.xlu0 %983  ;;  %v1222_v47 = vmul.f32 %v2700_v31, %v3508_v17  ;;  %v3676_v54 = vpop.eup %2701  ;;  %v1071_v63 = vmul.f32 1.442695, %v1018_v49 }
 0x2a2   :  { %v1069_v56 = vmul.f32 1.442695, %v1017_v37  ;;  %v3679_v15 = vpop.eup %2703  ;;  %v1024_v51 = vsub.f32 %v3525_v10, %v984_v45  ;;  %v1117_v23 = vsel %vm900_vm3, %v3676_v54, 0.0 }
 0x2a3   :  { %2521 = vmatmul.msk.f32.gmra.mxu1 %vm900_vm3, %v1222_v47  ;;  %v1111_v17 = vsel %vm900_vm3, %v3679_v15, 0.0 }
 0x2a4   :  { %2705 = vpow2.f32 %v1069_v56  ;;  %v1083_v1 = vmul.f32 1.442695, %v1024_v51 }
 0x2a5   :  { %2707 = vpow2.f32 %v1047_v42  ;;  %v2636_v42 = vunpack.i.h.bf16 %v3432_v30 }
 0x2a6   :  { %1118 = vadd.xlane.f32.xlu0 %v1117_v23  ;;  %2709 = vpow2.f32 %v1071_v63  ;;  %v933_v18 = vpop.xlane.xlu2 %932 }
 0x2a7   :  { %1112 = vadd.xlane.f32.xlu2 %v1111_v17  ;;  %v924_v0 = vpop.xlane.xlu1 %923  ;;  %v1007_v11 = vsub.f32 %v3535_v46, %v933_v18 }
 0x2a8   :  { %v1004_v25 = vsub.f32 %v3539_v39, %v924_v0 }
 0x2a9   :  { %v939_v5 = vpop.xlane.xlu0 %938  ;;  %v1049_v31 = vmul.f32 1.442695, %v1007_v11 }
 0x2aa   :  { %v3688_v29 = vpop.eup %2705  ;;  %v1043_v55 = vmul.f32 1.442695, %v1004_v25  ;;  %v1009_v2 = vsub.f32 %v3543_v43, %v939_v5 }
 0x2ab   :  { %v3690_v57 = vpop.eup %2707  ;;  %v1153_v10 = vsel %vm900_vm3, %v3688_v29, 0.0 }
 0x2ac   :  { %2711 = vpow2.f32 %v1043_v55  ;;  %1154 = vadd.xlane.f32.xlu1 %v1153_v10  ;;  %v1120_v4 = vsel %vm900_vm3, %v3690_v57, 0.0  ;;  %v3697_v6 = vpop.eup %2709  ;;  %v1053_v53 = vmul.f32 1.442695, %v1009_v2 }
 0x2ad   :  { %2713 = vpow2.f32 %v1083_v1  ;;  %v1156_v21 = vsel %vm900_vm3, %v3697_v6, 0.0 }
 0x2ae   :  { %v978_v63 = vpop.xlane.xlu2 %977 }
 0x2af   :  { %1121 = vadd.xlane.f32.xlu2 %v1120_v4  ;;  %v1143_v39 = vpop.xlane.xlu1 %1142  ;;  %v1022_v17 = vsub.f32 %v3555_v61, %v978_v63  ;;  %v2646_v63 = vunpack.i.h.bf16 %v3444_v36 }
 0x2b0   :  { %2715 = vrcp.f32 %v1143_v39 }
 0x2b1   :  { %v3699_v12 = vpop.xlane.xlu0 %992  ;;  %2717 = vpow2.f32 %v1053_v53  ;;  %v1079_v5 = vmul.f32 1.442695, %v1022_v17 }
 0x2b2   :  { %v3701_v58 = vpop.eup %2711  ;;  %2719 = vpow2.f32 %v1049_v31 }
 0x2b3   :  { %v3703_v32 = vpop.eup %2713  ;;  %v1114_v43 = vsel %vm900_vm3, %v3701_v58, 0.0 }
 0x2b4   :  { %1157 = vadd.xlane.f32.xlu1 %v1156_v21  ;;  %1115 = vadd.xlane.f32.xlu0 %v1114_v43  ;;  %v1174_v9 = vsel %vm900_vm3, %v3703_v32, 0.0 }
 0x2b6   :  { %v2716_v48 = vpop.eup %2715 }
 0x2b7   :  { %v1237_v28 = vmul.f32 %v2716_v48, %v3551_v52  ;;  %1175 = vadd.xlane.f32.xlu2 %v1174_v9  ;;  %v942_v45 = vpop.xlane.xlu1 %941  ;;  %v3717_v46 = vpop.eup %2717 }
 0x2b8   :  { %v1010_v52 = vsub.f32 %v3570_v7, %v942_v45  ;;  %v1129_v56 = vsel %vm900_vm3, %v3717_v46, 0.0  ;;  %v3722_v30 = vpop.eup %2719 }
 0x2b9   :  { %v975_v37 = vpop.xlane.xlu0 %974  ;;  %2522 = vmatmul.msk.f32.vlgmr.msrb.gmra.mxu2 %vm900_vm3, %v1237_v28  ;;  %v1123_v7 = vsel %vm900_vm3, %v3722_v30, 0.0 }
 0x2ba   :  { %v1021_v47 = vsub.f32 %v3574_v8, %v975_v37  ;;  %1586 = vmatpush.msrb.mxu2 %v2635_v35  ;;  %v1055_v51 = vmul.f32 1.442695, %v1010_v52 }
 0x2bc   :  { %v1077_v49 = vmul.f32 1.442695, %v1021_v47  ;;  %1587 = vmatpush.msrb.mxu2 %v2636_v42  ;;  %v1027_v42 = vsub.f32 %v3559_v62, %v3699_v12  ;;  %v2645_v12 = vunpack.i.l.bf16 %v3444_v36 }
 0x2be   :  { %2721 = vpow2.f32 %v1077_v49  ;;  %v1089_v49 = vmul.f32 1.442695, %v1027_v42 }
 0x2bf   :  { %1130 = vadd.xlane.f32.xlu2 %v1129_v56  ;;  %v945_v25 = vpop.xlane.xlu1 %944 }
 0x2c0   :  { %v1011_v61 = vsub.f32 %v3582_v13, %v945_v25 }
 0x2c1   :  { %v1146_v23 = vpop.xlane.xlu0 %1145 }
 0x2c2   :  { %2723 = vrcp.f32 %v1146_v23  ;;  %v1057_v39 = vmul.f32 1.442695, %v1011_v61  ;;  %v2620_v61 = vunpack.i.l.bf16 %v3469_v59 }
 0x2c3   :  { %2725 = vpow2.f32 %v1055_v51 }
 0x2c4   :  { %v3724_v8 = vpop.eup %2721  ;;  %2727 = vpow2.f32 %v1079_v5 }
 0x2c5   :  { %v1165_v0 = vsel %vm900_vm3, %v3724_v8, 0.0  ;;  %2729 = vpow2.f32 %v1057_v39  ;;  %v2621_v39 = vunpack.i.h.bf16 %v3469_v59 }
 0x2c6   :  { %1166 = vadd.xlane.f32.xlu1 %v1165_v0 }
 0x2c7   :  { %1124 = vadd.xlane.f32.xlu2 %v1123_v7  ;;  %v987_v53 = vpop.xlane.xlu1 %986 }
 0x2c8   :  { %v2724_v1 = vpop.eup %2723  ;;  %2648 = vrot.lane.b32.xlu0 %v3268_v14, %s2933_s1 }
 0x2c9   :  { %v996_v55 = vpop.xlane.xlu0 %995  ;;  %v1238_v10 = vmul.f32 %v2724_v1, %v3584_v16  ;;  %v3734_v2 = vpop.eup %2725  ;;  %v1025_v16 = vsub.f32 %v3592_v22, %v987_v53 }
 0x2ca   :  { %v1132_v4 = vsel %vm900_vm3, %v3734_v2, 0.0  ;;  %v3741_v43 = vpop.eup %2727  ;;  %v1028_v23 = vsub.f32 %v3598_v26, %v996_v55 }
 0x2cb   :  { %2523 = vmatmul.msk.f32.gmra.mxu2 %vm900_vm3, %v1238_v10  ;;  %v1168_v48 = vsel %vm900_vm3, %v3741_v43, 0.0  ;;  %v1085_v13 = vmul.f32 1.442695, %v1025_v16  ;;  %v3747_v35 = vpop.eup %2729 }
 0x2cc   :  { %v1135_v37 = vsel %vm900_vm3, %v3747_v35, 0.0  ;;  %v1091_v17 = vmul.f32 1.442695, %v1028_v23 }
 0x2cf   :  { %1133 = vadd.xlane.f32.xlu2 %v1132_v4  ;;  %v990_v1 = vpop.xlane.xlu1 %989 }
 0x2d1   :  { %v936_v18 = vpop.xlane.xlu0 %935 }
 0x2d2   :  { %v1008_v21 = vsub.f32 %v3610_v34, %v936_v18 }
 0x2d4   :  { %v1051_v11 = vmul.f32 1.442695, %v1008_v21 }
 0x2d6   :  { %2731 = vpow2.f32 %v1051_v11 }
 0x2d7   :  { %1169 = vadd.xlane.f32.xlu2 %v1168_v48  ;;  %2733 = vpow2.f32 %v1085_v13 }
 0x2d9   :  { %v948_v9 = vpop.xlane.xlu0 %947 }
 0x2da   :  { %v1012_v28 = vsub.f32 %v3619_v50, %v948_v9 }
 0x2dc   :  { %v3749_v31 = vpop.eup %2731  ;;  %v1059_v34 = vmul.f32 1.442695, %v1012_v28 }
 0x2dd   :  { %v1126_v22 = vsel %vm900_vm3, %v3749_v31, 0.0  ;;  %v3757_v50 = vpop.eup %2733 }
 0x2de   :  { %2735 = vpow2.f32 %v1059_v34  ;;  %1127 = vadd.xlane.f32.xlu1 %v1126_v22  ;;  %v1177_v52 = vsel %vm900_vm3, %v3757_v50, 0.0 }
 0x2df   :  { %1136 = vadd.xlane.f32.xlu2 %v1135_v37 }
 0x2e1   :  { %v1107_v45 = vpop.xlane.xlu0 %1106 }
 0x2e2   :  { %2737 = vrcp.f32 %v1107_v45 }
 0x2e3   :  { %2739 = vpow2.f32 %v1089_v49 }
 0x2e4   :  { %v3759_v47 = vpop.eup %2735  ;;  %2741 = vpow2.f32 %v1091_v17 }
 0x2e5   :  { %v1138_v56 = vsel %vm900_vm3, %v3759_v47, 0.0 }
 0x2e6   :  { %1178 = vadd.xlane.f32.xlu1 %v1177_v52 }
 0x2e7   :  { %1139 = vadd.xlane.f32.xlu2 %v1138_v56 }
 0x2e8   :  { %v2738_v51 = vpop.eup %2737 }
 0x2e9   :  { %v1225_v62 = vmul.f32 %v2738_v51, %v3623_v60  ;;  %v3770_v0 = vpop.eup %2739  ;;  %v2640_v51 = vunpack.i.l.bf16 %v3594_v24 }
 0x2ea   :  { %v1183_v25 = vsel %vm900_vm3, %v3770_v0, 0.0  ;;  %v3774_v26 = vpop.eup %2741 }
 0x2eb   :  { %2528 = vmatmul.msk.f32.vlgmr.msrb.gmra.mxu1 %vm900_vm3, %v1225_v62  ;;  %v1186_v5 = vsel %vm900_vm3, %v3774_v26, 0.0  ;;  %v2641_v62 = vunpack.i.h.bf16 %v3594_v24 }
 0x2ec   :  { %1691 = vmatpush.msrb.mxu1 %v2645_v12 }
 0x2ee   :  { %1692 = vmatpush.msrb.mxu1 %v2646_v63 }
 0x2f0   :  { %v1161_v7 = vpop.xlane.xlu2 %1160 }
 0x2f2   :  { %1184 = vadd.xlane.f32.xlu0 %v1183_v25 }
 0x2f8   :  { %v1101_v60 = vpop.xlane.xlu2 %1100 }
 0x2f9   :  { %2743 = vrcp.f32 %v1101_v60 }
 0x2fa   :  { %1187 = vadd.xlane.f32.xlu0 %v1186_v5 }
 0x2ff   :  { %v2744_v36 = vpop.eup %2743  ;;  %2653 = vrot.lane.b32.xlu2 %v3268_v14, %s2928_s5  ;;  %2658 = vrot.lane.b32.xlu1 %v3268_v14, %s2934_s2 }
 0x300   :  { %v1223_v55 = vmul.f32 %v2744_v36, %v3634_v20  ;;  %v1110_v10 = vpop.xlane.xlu2 %1109 }
 0x301   :  { %2745 = vrcp.f32 %v1110_v10  ;;  %v1149_v4 = vpop.xlane.xlu1 %1148 }
 0x302   :  { %2747 = vrcp.f32 %v1149_v4  ;;  %2524 = vmatmul.msk.f32.vlgmr.msrb.gmra.mxu3 %vm900_vm3, %v1223_v55 }
 0x303   :  { %1621 = vmatpush.msrb.mxu3 %v2620_v61 }
 0x305   :  { %1622 = vmatpush.msrb.mxu3 %v2621_v39 }
 0x307   :  { %v2746_v53 = vpop.eup %2745 }
 0x308   :  { %v2748_v18 = vpop.eup %2747  ;;  %v1226_v21 = vmul.f32 %v2746_v53, %v3640_v33  ;;  %v1026_v33 = vsub.f32 %v3606_v44, %v990_v1 }
 0x309   :  { %v1239_v14 = vmul.f32 %v2748_v18, %v3648_v27  ;;  %v1164_v16 = vpop.xlane.xlu0 %1163 }
 0x30a   :  { %v1152_v20 = vpop.xlane.xlu2 %1151  ;;  %2529 = vmatmul.msk.f32.gmra.mxu1 %vm900_vm3, %v1226_v21  ;;  %v1087_v22 = vmul.f32 1.442695, %v1026_v33 }
 0x30b   :  { %2749 = vrcp.f32 %v1152_v20  ;;  %2526 = vmatmul.msk.f32.vlgmr.msra.gmra.mxu0 %vm900_vm3, %v1239_v14 }
 0x30c   :  { %2751 = vrcp.f32 %v1161_v7 }
 0x311   :  { %v2750_v11 = vpop.eup %2749  ;;  %v1104_v48 = vpop.xlane.xlu0 %1103 }
 0x312   :  { %v1173_v13 = vpop.xlane.xlu2 %1172  ;;  %2753 = vrcp.f32 %v1104_v48  ;;  %v1240_v59 = vmul.f32 %v2750_v11, %v3658_v3  ;;  %v2752_v9 = vpop.eup %2751 }
 0x313   :  { %2755 = vrcp.f32 %v1164_v16  ;;  %v1243_v37 = vmul.f32 %v2752_v9, %v3629_v40  ;;  %v3831_v9 = vpop.f32.mrf.mxu1 }
 0x314   :  { %2527 = vmatmul.msk.f32.gmra.mxu0 %vm900_vm3, %v1240_v59 }
 0x318   :  { %v2754_v27 = vpop.eup %2753 }
 0x319   :  { %v1119_v28 = vpop.xlane.xlu0 %1118  ;;  %v1224_v34 = vmul.f32 %v2754_v27, %v3665_v19  ;;  %v2756_v3 = vpop.eup %2755 }
 0x31a   :  { %v1113_v42 = vpop.xlane.xlu2 %1112  ;;  %2757 = vrcp.f32 %v1119_v28  ;;  %v1244_v40 = vmul.f32 %v2756_v3, %v3655_v38 }
 0x31b   :  { %2759 = vrcp.f32 %v1113_v42  ;;  %2525 = vmatmul.msk.f32.gmra.mxu3 %vm900_vm3, %v1224_v34 }
 0x31c   :  { %2534 = vmatmul.msk.f32.vlgmr.msrb.gmra.mxu0 %vm900_vm3, %v1243_v37  ;;  %2761 = vpow2.f32 %v1087_v22 }
 0x31f   :  { %v1155_v45 = vpop.xlane.xlu1 %1154 }
 0x320   :  { %v2758_v44 = vpop.eup %2757  ;;  %2763 = vrcp.f32 %v1155_v45  ;;  %v3835_v34 = vpop.f32.mrf.mxu1 }
 0x321   :  { %v2760_v49 = vpop.eup %2759  ;;  %v1229_v52 = vmul.f32 %v2758_v44, %v3676_v54 }
 0x322   :  { %v1227_v19 = vmul.f32 %v2760_v49, %v3679_v15  ;;  %v1122_v56 = vpop.xlane.xlu2 %1121  ;;  %v3802_v23 = vpop.eup %2761 }
 0x323   :  { %2765 = vrcp.f32 %v1122_v56  ;;  %2536 = vmatmul.msk.f32.vlgmr.msra.gmra.mxu1 %vm900_vm3, %v1229_v52  ;;  %v1180_v38 = vsel %vm900_vm3, %v3802_v23, 0.0 }
 0x324   :  { %2532 = vmatmul.msk.f32.vlgmr.msra.gmra.mxu3 %vm900_vm3, %v1227_v19  ;;  %2535 = vmatmul.msk.f32.gmra.mxu0 %vm900_vm3, %v1244_v40 }
 0x325   :  { %1761 = vmatpush.msra.mxu3 %v2640_v51 }
 0x326   :  { %v2764_v54 = vpop.eup %2763 }
 0x327   :  { %v1241_v15 = vmul.f32 %v2764_v54, %v3688_v29  ;;  %1762 = vmatpush.msra.mxu3 %v2641_v62  ;;  %v1158_v12 = vpop.xlane.xlu1 %1157  ;;  %v1116_v63 = vpop.xlane.xlu0 %1115 }
 0x328   :  { %1181 = vadd.xlane.f32.xlu2 %v1180_v38  ;;  %2767 = vrcp.f32 %v1158_v12 }
 0x329   :  { %v2766_v17 = vpop.eup %2765  ;;  %2769 = vrcp.f32 %v1116_v63  ;;  %2530 = vmatmul.msk.f32.vlgmr.msra.gmra.mxu2 %vm900_vm3, %v1241_v15 }
 0x32a   :  { %v1176_v7 = vpop.xlane.xlu2 %1175  ;;  %v1230_v25 = vmul.f32 %v2766_v17, %v3690_v57 }
 0x32c   :  { %2537 = vmatmul.msk.f32.gmra.mxu1 %vm900_vm3, %v1230_v25 }
 0x32e   :  { %v2768_v24 = vpop.eup %2767 }
 0x32f   :  { %v2770_v60 = vpop.eup %2769  ;;  %v1242_v29 = vmul.f32 %v2768_v24, %v3697_v6 }
 0x330   :  { %v1228_v1 = vmul.f32 %v2770_v60, %v3701_v58 }
 0x331   :  { %2531 = vmatmul.msk.f32.gmra.mxu2 %vm900_vm3, %v1242_v29 }
 0x332   :  { %v1131_v5 = vpop.xlane.xlu2 %1130  ;;  %2533 = vmatmul.msk.f32.gmra.mxu3 %vm900_vm3, %v1228_v1 }
 0x333   :  { %2771 = vrcp.f32 %v1131_v5 }
 0x334   :  { %2773 = vrcp.f32 %v1173_v13 }
 0x339   :  { %v2772_v36 = vpop.eup %2771  ;;  %v1167_v55 = vpop.xlane.xlu1 %1166 }
 0x33a   :  { %v1233_v10 = vmul.f32 %v2772_v36, %v3717_v46  ;;  %v1125_v57 = vpop.xlane.xlu2 %1124  ;;  %2775 = vrcp.f32 %v1167_v55  ;;  %v2649_v61 = vpop.permute.xlu0 %2648 }
 0x33b   :  { %v2774_v4 = vpop.eup %2773  ;;  %2777 = vrcp.f32 %v1125_v57  ;;  %v2650_v39 = vunpack.i.l.bf16 %v2649_v61  ;;  %v2651_v6 = vunpack.i.h.bf16 %v2649_v61 }
 0x33c   :  { %2544 = vmatmul.msk.f32.vlgmr.msrb.gmra.mxu1 %vm900_vm3, %v1233_v10  ;;  %2779 = vrcp.f32 %v1176_v7  ;;  %v1247_v58 = vmul.f32 %v2774_v4, %v3667_v41 }
 0x33d   :  { %1656 = vmatpush.msra.mxu0 %v2650_v39 }
 0x33f   :  { %1657 = vmatpush.msra.mxu0 %v2651_v6 }
 0x340   :  { %v2776_v53 = vpop.eup %2775  ;;  %2542 = vmatmul.msk.f32.vlgmr.msra.gmra.mxu0 %vm900_vm3, %v1247_v58 }
 0x341   :  { %v2778_v18 = vpop.eup %2777  ;;  %v1245_v46 = vmul.f32 %v2776_v53, %v3724_v8 }
 0x342   :  { %v1231_v21 = vmul.f32 %v2778_v18, %v3722_v30  ;;  %v1134_v14 = vpop.xlane.xlu2 %1133  ;;  %v2780_v16 = vpop.eup %2779 }
 0x343   :  { %2781 = vrcp.f32 %v1134_v14  ;;  %2538 = vmatmul.msk.f32.vlgmr.msrb.gmra.mxu2 %vm900_vm3, %v1245_v46  ;;  %v1248_v20 = vmul.f32 %v2780_v16, %v3703_v32 }
 0x344   :  { %2540 = vmatmul.msk.f32.vlgmr.msrb.gmra.mxu3 %vm900_vm3, %v1231_v21 }
 0x348   :  { %2543 = vmatmul.msk.f32.gmra.mxu0 %vm900_vm3, %v1248_v20  ;;  %v1957_v20 = vld [vmem:[%s4219_s7 + $0x38] sm:$0xff] }
 0x349   :  { %v2782_v41 = vpop.eup %2781  ;;  %1982 = vmatpush.msra.mxu1 %v1957_v20 }
 0x34a   :  { %v1170_v11 = vpop.xlane.xlu2 %1169  ;;  %v1234_v48 = vmul.f32 %v2782_v41, %v3734_v2  ;;  %v1956_v41 = vld [vmem:[%s4219_s7 + $0x30] sm:$0xff] }
 0x34b   :  { %2783 = vrcp.f32 %v1170_v11  ;;  %1983 = vmatpush.msra.mxu1 %v1956_v41 }
 0x34c   :  { %2545 = vmatmul.msk.f32.gmra.mxu1 %vm900_vm3, %v1234_v48  ;;  %v1955_v48 = vld [vmem:[%s4219_s7 + $0x28] sm:$0xff] }
 0x34d   :  { %1984 = vmatpush.msra.mxu1 %v1955_v48 }
 0x351   :  { %v2784_v8 = vpop.eup %2783  ;;  %v1128_v30 = vpop.xlane.xlu1 %1127 }
 0x352   :  { %v1137_v13 = vpop.xlane.xlu2 %1136  ;;  %2785 = vrcp.f32 %v1128_v30  ;;  %v1246_v59 = vmul.f32 %v2784_v8, %v3741_v43 }
 0x353   :  { %2787 = vrcp.f32 %v1137_v13 }
 0x354   :  { %2539 = vmatmul.msk.f32.gmra.mxu2 %vm900_vm3, %v1246_v59 }
 0x358   :  { %v2786_v33 = vpop.eup %2785 }
 0x359   :  { %v1232_v32 = vmul.f32 %v2786_v33, %v3749_v31  ;;  %v1179_v27 = vpop.xlane.xlu1 %1178  ;;  %v2788_v2 = vpop.eup %2787  ;;  %v1954_v33 = vld [vmem:[%s4219_s7 + $0x20] sm:$0xff] }
 0x35a   :  { %v1140_v28 = vpop.xlane.xlu2 %1139  ;;  %2789 = vrcp.f32 %v1179_v27  ;;  %v1235_v22 = vmul.f32 %v2788_v2, %v3747_v35  ;;  %1985 = vmatpush.msra.mxu1 %v1954_v33  ;;  %v1952_v27 = vld [vmem:[%s4219_s7 + $0x10] sm:$0xff]  ;;  %v1951_v2 = vld [vmem:[%s4219_s7 + $0x8] sm:$0xff] }
 0x35b   :  { %2541 = vmatmul.msk.f32.gmra.mxu3 %vm900_vm3, %v1232_v32  ;;  %2791 = vrcp.f32 %v1140_v28  ;;  %v1953_v32 = vld [vmem:[%s4219_s7 + $0x18] sm:$0xff] }
 0x35c   :  { %1986 = vmatpush.msra.mxu1 %v1953_v32  ;;  %v2818_v32 = vld [vmem:[#allocation2 + $0x8] sm:$0xff] }
 0x35e   :  { %1987 = vmatpush.msra.mxu1 %v1952_v27 }
 0x360   :  { %v2790_v37 = vpop.eup %2789  ;;  %1988 = vmatpush.msra.mxu1 %v1951_v2 }
 0x361   :  { %v2792_v45 = vpop.eup %2791  ;;  %v1249_v31 = vmul.f32 %v2790_v37, %v3757_v50 }
 0x362   :  { %v2654_v43 = vpop.permute.xlu2 %2653  ;;  %v1236_v35 = vmul.f32 %v2792_v45, %v3759_v47 }
 0x363   :  { %v2655_v42 = vunpack.i.l.bf16 %v2654_v43  ;;  %2548 = vmatmul.msk.f32.vlgmr.msra.gmra.mxu3 %vm900_vm3, %v1235_v22  ;;  %v2656_v3 = vunpack.i.h.bf16 %v2654_v43  ;;  %v1950_v43 = vld [vmem:[%s4219_s7] sm:$0xff] }
 0x364   :  { %1989 = vmatpush.msra.mxu1 %v1950_v43  ;;  %v2819_v43 = vld [vmem:[#allocation2 + $0x10] sm:$0xff] }
 0x365   :  { %1726 = vmatpush.msra.mxu2 %v2655_v42  ;;  %v1185_v44 = vpop.xlane.xlu0 %1184 }
 0x366   :  { %2793 = vrcp.f32 %v1185_v44 }
 0x367   :  { %1727 = vmatpush.msra.mxu2 %v2656_v3 }
 0x368   :  { %2546 = vmatmul.msk.f32.vlgmr.msra.gmra.mxu2 %vm900_vm3, %v1249_v31  ;;  %v1414_v49 = vpop.f32.mrf.mxu1 }
 0x369   :  { %1825 = vrot.lane.b32.xlu1 %v1414_v49, %s2935_s6 }
 0x36b   :  { %2549 = vmatmul.msk.f32.gmra.mxu3 %vm900_vm3, %v1236_v35 }
 0x36c   :  { %v2794_v56 = vpop.eup %2793 }
 0x36d   :  { %v1188_v52 = vpop.xlane.xlu0 %1187  ;;  %v1251_v50 = vmul.f32 %v2794_v56, %v3770_v0  ;;  %v3851_v0 = vpop.f32.mrf.mxu2 }
 0x36e   :  { %2795 = vrcp.f32 %v1188_v52 }
 0x371   :  { %v2659_v19 = vpop.permute.xlu1 %2658 }
 0x372   :  { %v2660_v40 = vunpack.i.l.bf16 %v2659_v19  ;;  %v2661_v51 = vunpack.i.h.bf16 %v2659_v19 }
 0x374   :  { %1796 = vmatpush.msrb.mxu0 %v2660_v40  ;;  %v2796_v62 = vpop.eup %2795 }
 0x375   :  { %v1252_v54 = vmul.f32 %v2796_v62, %v3774_v26  ;;  %v3855_v25 = vpop.f32.mrf.mxu2 }
 0x376   :  { %1797 = vmatpush.msrb.mxu0 %v2661_v51 }
 0x377   :  { %2550 = vmatmul.msk.f32.vlgmr.msrb.gmra.mxu0 %vm900_vm3, %v1251_v50 }
 0x37f   :  { %2551 = vmatmul.msk.f32.gmra.mxu0 %vm900_vm3, %v1252_v54 }
 0x385   :  { %v1342_v47 = vpop.f32.mrf.mxu3 }
 0x386   :  { %1809 = vrot.lane.b32.xlu0 %v1342_v47, %s2926_s21 }
 0x387   :  { %v1417_v15 = vpop.f32.mrf.mxu1 }
 0x388   :  { %1827 = vrot.lane.b32.xlu1 %v1417_v15, %s2935_s6  ;;  %v1379_v38 = vpop.f32.mrf.mxu0 }
 0x390   :  { %1813 = vrot.lane.b32.xlu1 %v1379_v38, %s2926_s21 }
 0x391   :  { %v1382_v29 = vpop.f32.mrf.mxu0 }
 0x399   :  { %v1519_v36 = vpop.f32.mrf.mxu0 }
 0x39b   :  { %v1182_v12 = vpop.xlane.xlu2 %1181 }
 0x39c   :  { %2797 = vrcp.f32 %v1182_v12 }
 0x39e   :  { %v1345_v63 = vpop.f32.mrf.mxu3 }
 0x3a0   :  { %v1554_v17 = vpop.f32.mrf.mxu1 }
 0x3a1   :  { %1857 = vrot.lane.b32.xlu0 %v1554_v17, %s2936_s24  ;;  %v1522_v57 = vpop.f32.mrf.mxu0 }
 0x3a2   :  { %v2798_v26 = vpop.eup %2797 }
 0x3a3   :  { %v1250_v7 = vmul.f32 %v2798_v26, %v3802_v23 }
 0x3a5   :  { %2547 = vmatmul.msk.f32.gmra.mxu2 %vm900_vm3, %v1250_v7 }
 0x3a7   :  { %v1484_v24 = vpop.f32.mrf.mxu3 }
 0x3a8   :  { %1841 = vrot.lane.b32.xlu2 %v1484_v24, %s2937_s25 }
 0x3a9   :  { %1811 = vrot.lane.b32.xlu0 %v1345_v63, %s2926_s21  ;;  %v1557_v1 = vpop.f32.mrf.mxu1 }
 0x3ac   :  { %v1449_v60 = vpop.f32.mrf.mxu2 }
 0x3b0   :  { %1829 = vrot.lane.b32.xlu2 %v1449_v60, %s2935_s6 }
 0x3b1   :  { %1859 = vrot.lane.b32.xlu0 %v1557_v1, %s2936_s24 }
 0x3b4   :  { %v1452_v55 = vpop.f32.mrf.mxu2 }
 0x3b5   :  { %v1487_v5 = vpop.f32.mrf.mxu3 }
 0x3b8   :  { %1843 = vrot.lane.b32.xlu2 %v1487_v5, %s2937_s25 }
 0x3b9   :  { %1845 = vrot.lane.b32.xlu0 %v1519_v36, %s2937_s25  ;;  %v1694_v23 = vpop.f32.mrf.mxu1 }
 0x3bd   :  { %v1659_v39 = vpop.f32.mrf.mxu0 }
 0x3c1   :  { %1889 = vrot.lane.b32.xlu0 %v1694_v23, %s2938_s3 }
 0x3c5   :  { %v1662_v46 = vpop.f32.mrf.mxu0 }
 0x3c6   :  { %v1589_v4 = vpop.f32.mrf.mxu2 }
 0x3c7   :  { %v1624_v10 = vpop.f32.mrf.mxu3 }
 0x3c8   :  { %1873 = vrot.lane.b32.xlu1 %v1624_v10, %s2939_s26 }
 0x3c9   :  { %v1697_v61 = vpop.f32.mrf.mxu1 }
 0x3ca   :  { %1891 = vrot.lane.b32.xlu2 %v1697_v61, %s2938_s3 }
 0x3d0   :  { %1861 = vrot.lane.b32.xlu1 %v1589_v4, %s2936_s24 }
 0x3d2   :  { %1877 = vrot.lane.b32.xlu2 %v1659_v39, %s2939_s26 }
 0x3d7   :  { %v1592_v58 = vpop.f32.mrf.mxu2 }
 0x3da   :  { %1815 = vrot.lane.b32.xlu2 %v1382_v29, %s2926_s21 }
 0x3db   :  { %v1826_v11 = vpop.permute.xlu1 %1825 }
 0x3de   :  { %v1627_v6 = vpop.f32.mrf.mxu3 }
 0x3df   :  { %1875 = vrot.lane.b32.xlu1 %v1627_v6, %s2939_s26 }
 0x3e2   :  { %1863 = vrot.lane.b32.xlu2 %v1592_v58, %s2936_s24  ;;  %s2430_s24 = sshll.u32 %s4229_s17, 4  ;;  %s2431_s24 = int_to_ptr.hbm [resolvable:$true] %s2430_s24 }
 0x3e6   :  { %v1764_v53 = vpop.f32.mrf.mxu3 }
 0x3e7   :  { %1905 = vrot.lane.b32.xlu1 %v1764_v53, %s2940_s30 }
 0x3eb   :  { %v1729_v18 = vpop.f32.mrf.mxu2 }
 0x3ec   :  { %1893 = vrot.lane.b32.xlu0 %v1729_v18, %s2938_s3 }
 0x3ee   :  { %v1767_v21 = vpop.f32.mrf.mxu3 }
 0x3f4   :  { %1907 = vrot.lane.b32.xlu0 %v1767_v21, %s2940_s30  ;;  %v1799_v14 = vpop.f32.mrf.mxu0 }
 0x3f5   :  { %1909 = vrot.lane.b32.xlu1 %v1799_v14, %s2940_s30 }
 0x3f8   :  { %v1810_v8 = vpop.permute.xlu0 %1809 }
 0x3f9   :  { %v1917_v44 = vsel %vm251_vm1, %v3831_v9, %v1810_v8  ;;  %v2817_v8 = vld [vmem:[#allocation2] sm:$0xff] }
 0x3fa   :  { %v1828_v13 = vpop.permute.xlu1 %1827  ;;  %v1921_v52 = vsel %vm900_vm3, %v1917_v44, %v1826_v11 }
 0x3fc   :  { %1831 = vrot.lane.b32.xlu0 %v1452_v55, %s2935_s6  ;;  %v1802_v16 = vpop.f32.mrf.mxu0 }
 0x3fd   :  { %1847 = vrot.lane.b32.xlu1 %v1522_v57, %s2937_s25  ;;  %1911 = vrot.lane.b32.xlu2 %v1802_v16, %s2940_s30 }
 0x402   :  { %v1814_v28 = vpop.permute.xlu1 %1813  ;;  %v1842_v3 = vpop.permute.xlu2 %1841 }
 0x403   :  { %v1926_v19 = vsel %vm1925_vm5, %v1921_v52, %v1842_v3  ;;  %v1919_v60 = vsel %vm251_vm1, %v3851_v0, %v1814_v28 }
 0x404   :  { %1879 = vrot.lane.b32.xlu0 %v1662_v46, %s2939_s26 }
 0x40a   :  { %v1830_v49 = vpop.permute.xlu2 %1829 }
 0x40b   :  { %v1923_v29 = vsel %vm900_vm3, %v1919_v60, %v1830_v49 }
 0x412   :  { %v1844_v9 = vpop.permute.xlu2 %1843 }
 0x413   :  { %v1858_v59 = vpop.permute.xlu0 %1857 }
 0x414   :  { %v1931_v56 = vsel %vm1930_vm6, %v1926_v19, %v1858_v59 }
 0x41b   :  { %v1812_v22 = vpop.permute.xlu0 %1811 }
 0x41c   :  { %v1918_v47 = vsel %vm251_vm1, %v3835_v34, %v1812_v22 }
 0x41d   :  { %v1922_v15 = vsel %vm900_vm3, %v1918_v47, %v1828_v13 }
 0x41e   :  { %v1927_v12 = vsel %vm1925_vm5, %v1922_v15, %v1844_v9 }
 0x423   :  { %v1860_v42 = vpop.permute.xlu0 %1859 }
 0x424   :  { %v1892_v63 = vpop.permute.xlu2 %1891  ;;  %v1932_v17 = vsel %vm1930_vm6, %v1927_v12, %v1860_v42 }
 0x428   :  { %v1732_v30 = vpop.f32.mrf.mxu2 }
 0x429   :  { %1895 = vrot.lane.b32.xlu1 %v1732_v30, %s2938_s3 }
 0x42b   :  { %v1846_v31 = vpop.permute.xlu0 %1845 }
 0x42c   :  { %v1928_v1 = vsel %vm1925_vm5, %v1923_v29, %v1846_v31  ;;  %v1878_v36 = vpop.permute.xlu2 %1877  ;;  %v2820_v31 = vld [vmem:[#allocation2 + $0x18] sm:$0xff] }
 0x433   :  { %v1890_v40 = vpop.permute.xlu0 %1889 }
 0x434   :  { %v1816_v0 = vpop.permute.xlu2 %1815 }
 0x435   :  { %v1920_v4 = vsel %vm251_vm1, %v3855_v25, %v1816_v0  ;;  %v2665_v25 = vld [vmem:[%s4220_s8] ss:$0 sm:$0xff] }
 0x436   :  { %v2130_v0 = vld [vmem:[%s4221_s9 + $0x60] sm:$0xff] }
 0x43a   :  { %v1874_v37 = vpop.permute.xlu1 %1873 }
 0x43b   :  { %v1936_v51 = vsel %vm1935_vm7, %v1931_v56, %v1874_v37 }
 0x43c   :  { %v1941_v62 = vsel %vm1940_vm8, %v1936_v51, %v1890_v40  ;;  %v1864_v6 = vpop.permute.xlu2 %1863 }
 0x442   :  { %v1862_v45 = vpop.permute.xlu1 %1861 }
 0x443   :  { %v1933_v5 = vsel %vm1930_vm6, %v1928_v1, %v1862_v45 }
 0x444   :  { %v1938_v55 = vsel %vm1935_vm7, %v1933_v5, %v1878_v36 }
 0x451   :  { %v1876_v35 = vpop.permute.xlu1 %1875 }
 0x452   :  { %v1937_v26 = vsel %vm1935_vm7, %v1932_v17, %v1876_v35  ;;  %v2941_v35 = vmov 64.0  }
 0x453   :  { %v1942_v24 = vsel %vm1940_vm8, %v1937_v26, %v1892_v63  ;;  %2799 = vrcp.f32 %v2941_v35 }
 0x457   :  { %v1912_v16 = vpop.permute.xlu2 %1911 }
 0x459   :  { %v1906_v50 = vpop.permute.xlu1 %1905  ;;  %v2800_v52 = vpop.eup %2799 }
 0x45a   :  { %v1946_v54 = vsel %vm1945_vm9, %v1941_v62, %v1906_v50  ;;  %v2022_v19 = vmul.f32 64.0, %v2800_v52  ;;  %vm2026_vm10 = vweird.f32 %v2800_v52 }
 0x45b   :  { %2552 = vmatmul.msk.f32.vlgmr.msra.gmra.mxu1 %vm116_vm0, %v1946_v54 }
 0x45c   :  { %v2023_v56 = vsub.f32 1.0, %v2022_v19 }
 0x45e   :  { %v1894_v38 = vpop.permute.xlu0 %1893  ;;  %v2024_v40 = vmul.f32 %v2800_v52, %v2023_v56 }
 0x45f   :  { %v1943_v10 = vsel %vm1940_vm8, %v1938_v55, %v1894_v38 }
 0x460   :  { %v2025_v51 = vadd.f32 %v2800_v52, %v2024_v40 }
 0x462   :  { %v3940_v50 = vsel %vm2026_vm10, %v2800_v52, %v2025_v51 }
 0x466   :  { %v1908_v7 = vpop.permute.xlu0 %1907 }
 0x467   :  { %v1947_v34 = vsel %vm1945_vm9, %v1942_v24, %v1908_v7  ;;  %v1910_v23 = vpop.permute.xlu1 %1909 }
 0x468   :  { %2553 = vmatmul.msk.f32.gmra.mxu1 %vm116_vm0, %v1947_v34  ;;  %v1948_v57 = vsel %vm1945_vm9, %v1943_v10, %v1910_v23  ;;  %v2132_v10 = vld [vmem:[%s4221_s9 + $0x70] sm:$0xff] }
 0x469   :  { %2160 = vmatpush.msrb.mxu2 %v2132_v10  ;;  %v2247_v10 = vld [vmem:[%s4223_s11 + $0xe8] sm:$0xff] }
 0x46b   :  { %2161 = vmatpush.msrb.mxu2 %v2130_v0 }
 0x46e   :  { %v1832_v61 = vpop.permute.xlu0 %1831 }
 0x46f   :  { %v1848_v39 = vpop.permute.xlu1 %1847  ;;  %v1924_v58 = vsel %vm900_vm3, %v1920_v4, %v1832_v61  ;;  %v2131_v61 = vld [vmem:[%s4221_s9 + $0x68] sm:$0xff]  ;;  %v2128_v4 = vld [vmem:[%s4221_s9 + $0x50] sm:$0xff] }
 0x470   :  { %2554 = vmatmul.msk.f32.gmra.mxu1 %vm116_vm0, %v1948_v57  ;;  %v1929_v53 = vsel %vm1925_vm5, %v1924_v58, %v1848_v39  ;;  %v2133_v57 = vld [vmem:[%s4221_s9 + $0x78] sm:$0xff]  ;;  %2162 = vmatpush.msrb.mxu2 %v2128_v4  ;;  %v2127_v58 = vld [vmem:[%s4221_s9 + $0x48] sm:$0xff]  ;;  %v2246_v4 = vld [vmem:[%s4223_s11 + $0xe0] sm:$0xff] }
 0x471   :  { %v1934_v46 = vsel %vm1930_vm6, %v1929_v53, %v1864_v6  ;;  %2189 = vmatpush.msrb.mxu3 %v2133_v57  ;;  %v2129_v39 = vld [vmem:[%s4221_s9 + $0x58] sm:$0xff]  ;;  %v2126_v6 = vld [vmem:[%s4221_s9 + $0x40] sm:$0xff]  ;;  %v2124_v53 = vld [vmem:[%s4221_s9 + $0x30] sm:$0xff] }
 0x472   :  { %2163 = vmatpush.msrb.mxu2 %v2126_v6  ;;  %v2229_v6 = vld [vmem:[%s4223_s11 + $0x58] sm:$0xff] }
 0x473   :  { %2190 = vmatpush.msrb.mxu3 %v2131_v61  ;;  %v2230_v61 = vld [vmem:[%s4223_s11 + $0x60] sm:$0xff] }
 0x474   :  { %2164 = vmatpush.msrb.mxu2 %v2124_v53  ;;  %v2228_v53 = vld [vmem:[%s4223_s11 + $0x50] sm:$0xff] }
 0x475   :  { %2191 = vmatpush.msrb.mxu3 %v2129_v39 }
 0x476   :  { %v1880_v18 = vpop.permute.xlu0 %1879 }
 0x477   :  { %v1939_v21 = vsel %vm1935_vm7, %v1934_v46, %v1880_v18  ;;  %2192 = vmatpush.msrb.mxu3 %v2127_v58  ;;  %v2125_v18 = vld [vmem:[%s4221_s9 + $0x38] sm:$0xff]  ;;  %v2122_v46 = vld [vmem:[%s4221_s9 + $0x20] sm:$0xff] }
 0x478   :  { %2165 = vmatpush.msrb.mxu2 %v2122_v46  ;;  %v2245_v58 = vld [vmem:[%s4223_s11 + $0xd8] sm:$0xff]  ;;  %v2227_v46 = vld [vmem:[%s4223_s11 + $0x48] sm:$0xff] }
 0x479   :  { %2193 = vmatpush.msrb.mxu3 %v2125_v18  ;;  %v2244_v18 = vld [vmem:[%s4223_s11 + $0xd0] sm:$0xff] }
 0x49b   :  { %v1896_v14 = vpop.permute.xlu1 %1895 }
 0x49c   :  { %v1944_v20 = vsel %vm1940_vm8, %v1939_v21, %v1896_v14  ;;  %v2123_v21 = vld [vmem:[%s4221_s9 + $0x28] sm:$0xff]  ;;  %v2120_v14 = vld [vmem:[%s4221_s9 + $0x10] sm:$0xff] }
 0x49d   :  { %v1949_v41 = vsel %vm1945_vm9, %v1944_v20, %v1912_v16  ;;  %2194 = vmatpush.msrb.mxu3 %v2123_v21  ;;  %v2121_v16 = vld [vmem:[%s4221_s9 + $0x18] sm:$0xff]  ;;  %2166 = vmatpush.msrb.mxu2 %v2120_v14  ;;  %v2118_v20 = vld [vmem:[%s4221_s9] sm:$0xff]  ;;  %v2243_v21 = vld [vmem:[%s4223_s11 + $0xc8] sm:$0xff] }
 0x49e   :  { %2555 = vmatmul.msk.f32.gmra.mxu1 %vm116_vm0, %v1949_v41  ;;  %v2119_v41 = vld [vmem:[%s4221_s9 + $0x8] sm:$0xff]  ;;  %v2226_v14 = vld [vmem:[%s4223_s11 + $0x40] sm:$0xff] }
 0x49f   :  { %2195 = vmatpush.msrb.mxu3 %v2121_v16  ;;  %2167 = vmatpush.msrb.mxu2 %v2118_v20  ;;  %v2242_v16 = vld [vmem:[%s4223_s11 + $0xc0] sm:$0xff] }
 0x4a1   :  { %2196 = vmatpush.msrb.mxu3 %v2119_v41  ;;  %v2225_v41 = vld [vmem:[%s4223_s11 + $0x38] sm:$0xff] }
 0x4d8   :  { %v1991_v11 = vpop.f32.mrf.mxu1 }
 0x4d9   :  { %v1992_v48 = vadd.f32 %v2665_v25, %v1991_v11 }
 0x4db   :  { %v2003_v30 = vadd.f32 %v2817_v8, %v1992_v48 }
 0x4dd   :  { %v2009_v13 = vsel %vm116_vm0, %v2003_v30, 0.0 }
 0x4de   :  { %2010 = vadd.xlane.f32.xlu0 %v2009_v13 }
 0x4e5   :  { %v1994_v59 = vpop.f32.mrf.mxu1 }
 0x4e6   :  { %v1995_v33 = vadd.f32 %v2665_v25, %v1994_v59 }
 0x4e8   :  { %v2004_v27 = vadd.f32 %v2818_v32, %v1995_v33 }
 0x4ea   :  { %v2012_v28 = vsel %vm116_vm0, %v2004_v27, 0.0 }
 0x4eb   :  { %2013 = vadd.xlane.f32.xlu1 %v2012_v28 }
 0x4ed   :  { %v1997_v2 = vpop.f32.mrf.mxu1 }
 0x4ee   :  { %v1998_v22 = vadd.f32 %v2665_v25, %v1997_v2 }
 0x4f0   :  { %v2005_v37 = vadd.f32 %v2819_v43, %v1998_v22  ;;  %v4019_v22 = vld [vmem:[%s4225_s13] ss:$0 sm:$0xff] }
 0x4f2   :  { %v2015_v42 = vsel %vm116_vm0, %v2005_v37, 0.0 }
 0x4f3   :  { %2016 = vadd.xlane.f32.xlu2 %v2015_v42 }
 0x51b   :  { %v2000_v3 = vpop.f32.mrf.mxu1 }
 0x51c   :  { %v2001_v45 = vadd.f32 %v2665_v25, %v2000_v3 }
 0x51e   :  { %v2006_v44 = vadd.f32 %v2820_v31, %v2001_v45  ;;  %v4026_v45 = vld [vmem:[%s4226_s14] ss:$0 sm:$0xff] }
 0x520   :  { %v2018_v49 = vsel %vm116_vm0, %v2006_v44, 0.0 }
 0x521   :  { %2019 = vadd.xlane.f32.xlu0 %v2018_v49 }
 0x551   :  { %v2011_v62 = vpop.xlane.xlu0 %2010 }
 0x552   :  { %v2028_v9 = vmul.f32 %v3940_v50, %v2011_v62 }
 0x554   :  { %v3943_v54 = vsub.f32 %v2003_v30, %v2028_v9 }
 0x556   :  { %v2036_v47 = vmul.f32 %v3943_v54, %v3943_v54 }
 0x558   :  { %v2040_v15 = vsel %vm116_vm0, %v2036_v47, 0.0 }
 0x559   :  { %2041 = vadd.xlane.f32.xlu2 %v2040_v15 }
 0x55e   :  { %v2014_v38 = vpop.xlane.xlu1 %2013 }
 0x55f   :  { %v2029_v12 = vmul.f32 %v3940_v50, %v2014_v38 }
 0x561   :  { %v3949_v63 = vsub.f32 %v2004_v27, %v2029_v12 }
 0x563   :  { %v2037_v17 = vmul.f32 %v3949_v63, %v3949_v63 }
 0x565   :  { %v2043_v26 = vsel %vm116_vm0, %v2037_v17, 0.0 }
 0x566   :  { %2044 = vadd.xlane.f32.xlu1 %v2043_v26  ;;  %v2017_v7 = vpop.xlane.xlu2 %2016 }
 0x567   :  { %v2030_v24 = vmul.f32 %v3940_v50, %v2017_v7 }
 0x569   :  { %v3955_v60 = vsub.f32 %v2005_v37, %v2030_v24 }
 0x56b   :  { %v2038_v34 = vmul.f32 %v3955_v60, %v3955_v60 }
 0x56d   :  { %v2046_v29 = vsel %vm116_vm0, %v2038_v34, 0.0 }
 0x56e   :  { %2047 = vadd.xlane.f32.xlu0 %v2046_v29 }
 0x594   :  { %v2020_v1 = vpop.xlane.xlu0 %2019 }
 0x595   :  { %v2031_v5 = vmul.f32 %v3940_v50, %v2020_v1  ;;  %v2233_v1 = vld [vmem:[%s4223_s11 + $0x78] sm:$0xff] }
 0x596   :  { %2254 = vmatpush.msra.mxu0 %v2233_v1 }
 0x597   :  { %v3961_v36 = vsub.f32 %v2006_v44, %v2031_v5  ;;  %v2249_v5 = vld [vmem:[%s4223_s11 + $0xf8] sm:$0xff] }
 0x598   :  { %2283 = vmatpush.msrb.mxu1 %v2249_v5 }
 0x599   :  { %v2039_v23 = vmul.f32 %v3961_v36, %v3961_v36 }
 0x59b   :  { %v2049_v55 = vsel %vm116_vm0, %v2039_v23, 0.0  ;;  %v2248_v23 = vld [vmem:[%s4223_s11 + $0xf0] sm:$0xff] }
 0x59c   :  { %2050 = vadd.xlane.f32.xlu2 %v2049_v55  ;;  %v2231_v55 = vld [vmem:[%s4223_s11 + $0x68] sm:$0xff]  ;;  %2284 = vmatpush.msrb.mxu1 %v2248_v23 }
 0x59e   :  { %2285 = vmatpush.msrb.mxu1 %v2247_v10 }
 0x5a0   :  { %2286 = vmatpush.msrb.mxu1 %v2246_v4 }
 0x5a2   :  { %2287 = vmatpush.msrb.mxu1 %v2245_v58  ;;  %v2668_v58 = vld [vmem:[%s4224_s12] ss:$0 sm:$0xff] }
 0x5a4   :  { %2288 = vmatpush.msrb.mxu1 %v2244_v18 }
 0x5a6   :  { %2289 = vmatpush.msrb.mxu1 %v2243_v21 }
 0x5a8   :  { %2290 = vmatpush.msrb.mxu1 %v2242_v16 }
 0x5cc   :  { %v2042_v25 = vpop.xlane.xlu2 %2041 }
 0x5cd   :  { %v2052_v11 = vmul.f32 %v2042_v25, %v3940_v50  ;;  %v2241_v25 = vld [vmem:[%s4223_s11 + $0xb8] sm:$0xff] }
 0x5ce   :  { %2291 = vmatpush.msrb.mxu1 %v2241_v25 }
 0x5cf   :  { %v2056_v48 = vadd.f32 1e-05, %v2052_v11 }
 0x5d1   :  { %2801 = vrsqrt.f32 %v2056_v48  ;;  %vm2066_vm12 = vweird.f32 %v2056_v48 }
 0x5d7   :  { %v2802_v8 = vpop.eup %2801 }
 0x5d8   :  { %v2061_v30 = vmul.f32 %v2802_v8, %v2056_v48  ;;  %vm2067_vm11 = vweird.f32 %v2802_v8  ;;  %v2224_v48 = vld [vmem:[%s4223_s11 + $0x30] sm:$0xff] }
 0x5d9   :  { %v2045_v13 = vpop.xlane.xlu1 %2044  ;;  %vm2068_vm13 = vmor %vm2066_vm12, %vm2067_vm11 }
 0x5da   :  { %v2062_v59 = vmul.f32 %v2802_v8, %v2061_v30  ;;  %v2053_v33 = vmul.f32 %v2045_v13, %v3940_v50  ;;  %v2223_v13 = vld [vmem:[%s4223_s11 + $0x28] sm:$0xff] }
 0x5dc   :  { %v2063_v32 = vmul.f32 0.5, %v2062_v59  ;;  %v2057_v27 = vadd.f32 1e-05, %v2053_v33  ;;  %v2239_v59 = vld [vmem:[%s4223_s11 + $0xa8] sm:$0xff] }
 0x5de   :  { %v2064_v28 = vsub.f32 1.5, %v2063_v32  ;;  %2803 = vrsqrt.f32 %v2057_v27  ;;  %vm2076_vm15 = vweird.f32 %v2057_v27  ;;  %v2222_v32 = vld [vmem:[%s4223_s11 + $0x20] sm:$0xff] }
 0x5e0   :  { %v2065_v2 = vmul.f32 %v2802_v8, %v2064_v28 }
 0x5e1   :  { %v2048_v43 = vpop.xlane.xlu0 %2047 }
 0x5e2   :  { %v2069_v37 = vsel %vm2068_vm13, %v2802_v8, %v2065_v2  ;;  %v2054_v42 = vmul.f32 %v2048_v43, %v3940_v50  ;;  %v2240_v8 = vld [vmem:[%s4223_s11 + $0xb0] sm:$0xff]  ;;  %v2221_v2 = vld [vmem:[%s4223_s11 + $0x18] sm:$0xff] }
 0x5e3   :  { %v2100_v3 = vmul.f32 %v2069_v37, %v3943_v54  ;;  %2292 = vmatpush.msrb.mxu1 %v2240_v8  ;;  %v2237_v43 = vld [vmem:[%s4223_s11 + $0x98] sm:$0xff] }
 0x5e4   :  { %v2804_v31 = vpop.eup %2803  ;;  %v2058_v44 = vadd.f32 1e-05, %v2054_v42 }
 0x5e5   :  { %v2107_v49 = vmul.f32 %v4019_v22, %v2100_v3  ;;  %v2071_v35 = vmul.f32 %v2804_v31, %v2057_v27  ;;  %vm2077_vm14 = vweird.f32 %v2804_v31  ;;  %v2238_v27 = vld [vmem:[%s4223_s11 + $0xa0] sm:$0xff]  ;;  %2293 = vmatpush.msrb.mxu1 %v2239_v59 }
 0x5e6   :  { %2805 = vrsqrt.f32 %v2058_v44  ;;  %vm2078_vm1 = vmor %vm2076_vm15, %vm2077_vm14  ;;  %vm2086_vm3 = vweird.f32 %v2058_v44 }
 0x5e7   :  { %v2072_v52 = vmul.f32 %v2804_v31, %v2071_v35  ;;  %v4030_v19 = vadd.f32 %v4026_v45, %v2107_v49  ;;  %2294 = vmatpush.msrb.mxu1 %v2238_v27  ;;  %v2220_v49 = vld [vmem:[%s4223_s11 + $0x10] sm:$0xff] }
 0x5e8   :  { %v2236_v35 = vld [vmem:[%s4223_s11 + $0x90] sm:$0xff] }
 0x5e9   :  { %v2073_v56 = vmul.f32 0.5, %v2072_v52  ;;  %2556 = vmatmul.msk.f32.vlgmr.msrb.gmra.mxu2 %vm116_vm0, %v4030_v19  ;;  %2560 = vmatmul.msk.f32.vlgmr.msrb.gmra.mxu3 %vm116_vm0, %v4030_v19  ;;  %v2234_v52 = vld [vmem:[%s4223_s11 + $0x80] sm:$0xff] }
 0x5ea   :  { %2295 = vmatpush.msrb.mxu1 %v2237_v43 }
 0x5eb   :  { %v2074_v40 = vsub.f32 1.5, %v2073_v56  ;;  %v2134_v56 = vld [vmem:[%s4222_s10] sm:$0x3] }
 0x5ec   :  { %v2806_v51 = vpop.eup %2805  ;;  %2296 = vmatpush.msrb.mxu1 %v2236_v35 }
 0x5ed   :  { %v2075_v62 = vmul.f32 %v2804_v31, %v2074_v40  ;;  %v2081_v9 = vmul.f32 %v2806_v51, %v2058_v44  ;;  %vm2087_vm2 = vweird.f32 %v2806_v51  ;;  %v2136_v40 = vperm.slane %v2134_v56, 0 }
 0x5ee   :  { %vm2088_vm4 = vmor %vm2086_vm3, %vm2087_vm2 }
 0x5ef   :  { %v2079_v54 = vsel %vm2078_vm1, %v2804_v31, %v2075_v62  ;;  %v2082_v47 = vmul.f32 %v2806_v51, %v2081_v9 }
 0x5f0   :  { %v2101_v15 = vmul.f32 %v2079_v54, %v3949_v63 }
 0x5f1   :  { %v2083_v38 = vmul.f32 0.5, %v2082_v47 }
 0x5f2   :  { %v2108_v12 = vmul.f32 %v4019_v22, %v2101_v15 }
 0x5f3   :  { %v2084_v17 = vsub.f32 1.5, %v2083_v38 }
 0x5f4   :  { %v4039_v26 = vadd.f32 %v4026_v45, %v2108_v12 }
 0x5f5   :  { %v2085_v7 = vmul.f32 %v2806_v51, %v2084_v17 }
 0x5f6   :  { %2557 = vmatmul.msk.f32.gmra.mxu2 %vm116_vm0, %v4039_v26  ;;  %2561 = vmatmul.msk.f32.gmra.mxu3 %vm116_vm0, %v4039_v26 }
 0x5f7   :  { %v2089_v24 = vsel %vm2088_vm4, %v2806_v51, %v2085_v7  ;;  %v2137_v51 = vperm.slane %v2134_v56, 1 }
 0x5f8   :  { %v2102_v63 = vmul.f32 %v2089_v24, %v3955_v60  ;;  %v2232_v60 = vld [vmem:[%s4223_s11 + $0x70] sm:$0xff] }
 0x5f9   :  { %2255 = vmatpush.msra.mxu0 %v2232_v60 }
 0x5fa   :  { %v2109_v34 = vmul.f32 %v4019_v22, %v2102_v63 }
 0x5fb   :  { %2256 = vmatpush.msra.mxu0 %v2231_v55 }
 0x5fc   :  { %v4048_v29 = vadd.f32 %v4026_v45, %v2109_v34 }
 0x5fd   :  { %2257 = vmatpush.msra.mxu0 %v2230_v61 }
 0x5fe   :  { %2558 = vmatmul.msk.f32.gmra.mxu2 %vm116_vm0, %v4048_v29  ;;  %2562 = vmatmul.msk.f32.gmra.mxu3 %vm116_vm0, %v4048_v29 }
 0x5ff   :  { %2258 = vmatpush.msra.mxu0 %v2229_v6 }
 0x601   :  { %2259 = vmatpush.msra.mxu0 %v2228_v53 }
 0x603   :  { %2260 = vmatpush.msra.mxu0 %v2227_v46 }
 0x605   :  { %2261 = vmatpush.msra.mxu0 %v2226_v14 }
 0x607   :  { %2262 = vmatpush.msra.mxu0 %v2225_v41 }
 0x609   :  { %2263 = vmatpush.msra.mxu0 %v2224_v48 }
 0x60b   :  { %2264 = vmatpush.msra.mxu0 %v2223_v13 }
 0x60d   :  { %2265 = vmatpush.msra.mxu0 %v2222_v32 }
 0x60f   :  { %v2051_v57 = vpop.xlane.xlu2 %2050  ;;  %2266 = vmatpush.msra.mxu0 %v2221_v2 }
 0x610   :  { %v2055_v0 = vmul.f32 %v2051_v57, %v3940_v50 }
 0x611   :  { %2267 = vmatpush.msra.mxu0 %v2220_v49 }
 0x612   :  { %v2059_v39 = vadd.f32 1e-05, %v2055_v0 }
 0x614   :  { %2807 = vrsqrt.f32 %v2059_v39  ;;  %vm2096_vm6 = vweird.f32 %v2059_v39 }
 0x61a   :  { %v2808_v20 = vpop.eup %2807 }
 0x61b   :  { %v2091_v11 = vmul.f32 %v2808_v20, %v2059_v39  ;;  %vm2097_vm5 = vweird.f32 %v2808_v20 }
 0x61c   :  { %vm2098_vm7 = vmor %vm2096_vm6, %vm2097_vm5 }
 0x61d   :  { %v2092_v30 = vmul.f32 %v2808_v20, %v2091_v11 }
 0x61f   :  { %v2093_v33 = vmul.f32 0.5, %v2092_v30 }
 0x621   :  { %v2094_v28 = vsub.f32 1.5, %v2093_v33 }
 0x623   :  { %v2095_v37 = vmul.f32 %v2808_v20, %v2094_v28 }
 0x625   :  { %v2099_v42 = vsel %vm2098_vm7, %v2808_v20, %v2095_v37 }
 0x626   :  { %v2103_v3 = vmul.f32 %v2099_v42, %v3961_v36  ;;  %v2219_v36 = vld [vmem:[%s4223_s11 + $0x8] sm:$0xff] }
 0x627   :  { %2268 = vmatpush.msra.mxu0 %v2219_v36 }
 0x628   :  { %v2110_v31 = vmul.f32 %v4019_v22, %v2103_v3  ;;  %v2235_v22 = vld [vmem:[%s4223_s11 + $0x88] sm:$0xff] }
 0x629   :  { %2297 = vmatpush.msrb.mxu1 %v2235_v22 }
 0x62a   :  { %v4136_v44 = vadd.f32 %v4026_v45, %v2110_v31  ;;  %v2218_v45 = vld [vmem:[%s4223_s11] sm:$0xff] }
 0x62b   :  { %2269 = vmatpush.msra.mxu0 %v2218_v45  ;;  %2298 = vmatpush.msrb.mxu1 %v2234_v52 }
 0x62c   :  { %2559 = vmatmul.msk.f32.gmra.mxu2 %vm116_vm0, %v4136_v44  ;;  %2563 = vmatmul.msk.f32.gmra.mxu3 %vm116_vm0, %v4136_v44 }
 0x66c   :  { %v2169_v62 = vpop.f32.mrf.mxu2  ;;  %v2198_v9 = vpop.f32.mrf.mxu3 }
 0x66d   :  { %v2170_v54 = vadd.f32 %v2169_v62, %v2136_v40  ;;  %v2199_v47 = vadd.f32 %v2198_v9, %v2137_v51 }
 0x66f   :  { %v2210_v15 = vmax.f32 %v2170_v54, 0.0  ;;  %v2211_v38 = vmax.f32 %v2199_v47, 0.0 }
 0x671   :  { %2270 = vmatmul.f32.vlgmr.msra.gmra.mxu0 %v2210_v15  ;;  %2299 = vmatmul.f32.vlgmr.msrb.gmra.mxu1 %v2211_v38 }
 0x679   :  { %v2172_v12 = vpop.f32.mrf.mxu2  ;;  %v2201_v17 = vpop.f32.mrf.mxu3 }
 0x67a   :  { %v2173_v7 = vadd.f32 %v2172_v12, %v2136_v40  ;;  %v2202_v24 = vadd.f32 %v2201_v17, %v2137_v51 }
 0x67c   :  { %v2212_v63 = vmax.f32 %v2173_v7, 0.0  ;;  %v2213_v34 = vmax.f32 %v2202_v24, 0.0 }
 0x67e   :  { %2273 = vmatmul.f32.gmra.mxu0 %v2212_v63  ;;  %2302 = vmatmul.f32.gmra.mxu1 %v2213_v34 }
 0x681   :  { %v2175_v1 = vpop.f32.mrf.mxu2  ;;  %v2204_v5 = vpop.f32.mrf.mxu3 }
 0x682   :  { %v2176_v60 = vadd.f32 %v2175_v1, %v2136_v40  ;;  %v2205_v23 = vadd.f32 %v2204_v5, %v2137_v51 }
 0x684   :  { %v2214_v55 = vmax.f32 %v2176_v60, 0.0  ;;  %v2215_v10 = vmax.f32 %v2205_v23, 0.0 }
 0x686   :  { %2276 = vmatmul.f32.gmra.mxu0 %v2214_v55  ;;  %2305 = vmatmul.f32.gmra.mxu1 %v2215_v10 }
 0x6af   :  { %v2178_v57 = vpop.f32.mrf.mxu2  ;;  %v2207_v0 = vpop.f32.mrf.mxu3 }
 0x6b0   :  { %v2179_v61 = vadd.f32 %v2178_v57, %v2136_v40  ;;  %v2208_v4 = vadd.f32 %v2207_v0, %v2137_v51  ;;  %v2669_v57 = vld [vmem:[%s4227_s15] ss:$0 sm:$0xff]  ;;  %s2942_s15 = smov [#allocation8]  }
 0x6b2   :  { %v2216_v39 = vmax.f32 %v2179_v61, 0.0  ;;  %v2217_v6 = vmax.f32 %v2208_v4, 0.0 }
 0x6b4   :  { %2279 = vmatmul.f32.gmra.mxu0 %v2216_v39  ;;  %2308 = vmatmul.f32.gmra.mxu1 %v2217_v6  ;;  %v2670_v39 = vld [vmem:[%s4228_s16] ss:$0 sm:$0xff]  ;;  %s2428_s16 = sshll.u32 %s2942_s15, 4  ;;  %s2429_s16 = int_to_ptr.vmem [resolvable:$true] %s2428_s16 }
 0x6ee   :  { %v2271_v53 = vpop.f32.mrf.mxu0  ;;  %v2300_v46 = vpop.f32.mrf.mxu1 }
 0x6ef   :  { %v2272_v18 = vadd.f32 %v2668_v58, %v2271_v53 }
 0x6f1   :  { %v2301_v21 = vadd.f32 %v2300_v46, %v2272_v18 }
 0x6f3   :  { %v2312_v14 = vadd.f32 %v2301_v21, %v4030_v19 }
 0x6f5   :  { %v2318_v16 = vsel %vm116_vm0, %v2312_v14, 0.0 }
 0x6f6   :  { %2319 = vadd.xlane.f32.xlu1 %v2318_v16 }
 0x6fb   :  { %v2274_v20 = vpop.f32.mrf.mxu0  ;;  %v2303_v41 = vpop.f32.mrf.mxu1 }
 0x6fc   :  { %v2275_v25 = vadd.f32 %v2668_v58, %v2274_v20 }
 0x6fe   :  { %v2304_v11 = vadd.f32 %v2303_v41, %v2275_v25 }
 0x700   :  { %v2313_v48 = vadd.f32 %v2304_v11, %v4039_v26 }
 0x702   :  { %v2321_v8 = vsel %vm116_vm0, %v2313_v48, 0.0 }
 0x703   :  { %v2277_v30 = vpop.f32.mrf.mxu0  ;;  %2322 = vadd.xlane.f32.xlu0 %v2321_v8  ;;  %v2306_v59 = vpop.f32.mrf.mxu1 }
 0x704   :  { %v2278_v13 = vadd.f32 %v2668_v58, %v2277_v30 }
 0x706   :  { %v2307_v33 = vadd.f32 %v2306_v59, %v2278_v13 }
 0x708   :  { %v2314_v32 = vadd.f32 %v2307_v33, %v4048_v29 }
 0x70a   :  { %v2324_v19 = vsel %vm116_vm0, %v2314_v32, 0.0 }
 0x70b   :  { %2325 = vadd.xlane.f32.xlu2 %v2324_v19 }
 0x731   :  { %v2280_v27 = vpop.f32.mrf.mxu0  ;;  %v2309_v2 = vpop.f32.mrf.mxu1 }
 0x732   :  { %v2281_v28 = vadd.f32 %v2668_v58, %v2280_v27 }
 0x734   :  { %v2310_v43 = vadd.f32 %v2309_v2, %v2281_v28 }
 0x736   :  { %v2315_v37 = vadd.f32 %v2310_v43, %v4136_v44 }
 0x738   :  { %v2327_v26 = vsel %vm116_vm0, %v2315_v37, 0.0 }
 0x739   :  { %2328 = vadd.xlane.f32.xlu1 %v2327_v26 }
 0x769   :  { %v2320_v42 = vpop.xlane.xlu1 %2319 }
 0x76a   :  { %v2330_v3 = vmul.f32 %v2320_v42, %v3940_v50 }
 0x76c   :  { %v2334_v31 = vsub.f32 %v2312_v14, %v2330_v3 }
 0x76e   :  { %v2338_v49 = vmul.f32 %v2334_v31, %v2334_v31 }
 0x770   :  { %v2342_v35 = vsel %vm116_vm0, %v2338_v49, 0.0 }
 0x771   :  { %2343 = vadd.xlane.f32.xlu0 %v2342_v35 }
 0x776   :  { %v2323_v29 = vpop.xlane.xlu0 %2322 }
 0x777   :  { %v2331_v36 = vmul.f32 %v2323_v29, %v3940_v50 }
 0x779   :  { %v2335_v22 = vsub.f32 %v2313_v48, %v2331_v36 }
 0x77b   :  { %v2339_v45 = vmul.f32 %v2335_v22, %v2335_v22 }
 0x77d   :  { %v2345_v52 = vsel %vm116_vm0, %v2339_v45, 0.0 }
 0x77e   :  { %2346 = vadd.xlane.f32.xlu2 %v2345_v52  ;;  %v2326_v44 = vpop.xlane.xlu2 %2325 }
 0x77f   :  { %v2332_v56 = vmul.f32 %v2326_v44, %v3940_v50 }
 0x781   :  { %v4179_v40 = vsub.f32 %v2314_v32, %v2332_v56 }
 0x783   :  { %v2340_v51 = vmul.f32 %v4179_v40, %v4179_v40 }
 0x785   :  { %v2348_v62 = vsel %vm116_vm0, %v2340_v51, 0.0 }
 0x786   :  { %2349 = vadd.xlane.f32.xlu1 %v2348_v62 }
 0x7ac   :  { %v2329_v9 = vpop.xlane.xlu1 %2328 }
 0x7ad   :  { %v2333_v54 = vmul.f32 %v2329_v9, %v3940_v50 }
 0x7af   :  { %v4185_v47 = vsub.f32 %v2315_v37, %v2333_v54 }
 0x7b1   :  { %v2341_v15 = vmul.f32 %v4185_v47, %v4185_v47 }
 0x7b3   :  { %v2351_v38 = vsel %vm116_vm0, %v2341_v15, 0.0 }
 0x7b4   :  { %2352 = vadd.xlane.f32.xlu0 %v2351_v38 }
 0x7e4   :  { %v2344_v12 = vpop.xlane.xlu0 %2343 }
 0x7e5   :  { %v2354_v17 = vmul.f32 %v2344_v12, %v3940_v50 }
 0x7e7   :  { %v2358_v7 = vadd.f32 1e-05, %v2354_v17 }
 0x7e9   :  { %2809 = vrsqrt.f32 %v2358_v7  ;;  %vm2368_vm9 = vweird.f32 %v2358_v7 }
 0x7ef   :  { %v2810_v24 = vpop.eup %2809 }
 0x7f0   :  { %v2363_v63 = vmul.f32 %v2810_v24, %v2358_v7  ;;  %vm2369_vm8 = vweird.f32 %v2810_v24 }
 0x7f1   :  { %v2347_v34 = vpop.xlane.xlu2 %2346  ;;  %vm2370_vm10 = vmor %vm2368_vm9, %vm2369_vm8 }
 0x7f2   :  { %v2364_v1 = vmul.f32 %v2810_v24, %v2363_v63  ;;  %v2355_v5 = vmul.f32 %v2347_v34, %v3940_v50 }
 0x7f4   :  { %v2365_v60 = vmul.f32 0.5, %v2364_v1  ;;  %v2359_v23 = vadd.f32 1e-05, %v2355_v5 }
 0x7f6   :  { %v2366_v55 = vsub.f32 1.5, %v2365_v60  ;;  %2811 = vrsqrt.f32 %v2359_v23  ;;  %vm2378_vm12 = vweird.f32 %v2359_v23 }
 0x7f8   :  { %v2367_v10 = vmul.f32 %v2810_v24, %v2366_v55 }
 0x7f9   :  { %v2350_v0 = vpop.xlane.xlu1 %2349 }
 0x7fa   :  { %v2371_v61 = vsel %vm2370_vm10, %v2810_v24, %v2367_v10  ;;  %v2356_v4 = vmul.f32 %v2350_v0, %v3940_v50 }
 0x7fb   :  { %v2402_v6 = vmul.f32 %v2371_v61, %v2334_v31 }
 0x7fc   :  { %v2812_v58 = vpop.eup %2811  ;;  %v2360_v53 = vadd.f32 1e-05, %v2356_v4 }
 0x7fd   :  { %v2409_v18 = vmul.f32 %v2669_v57, %v2402_v6  ;;  %v2373_v46 = vmul.f32 %v2812_v58, %v2359_v23  ;;  %vm2379_vm11 = vweird.f32 %v2812_v58 }
 0x7fe   :  { %2813 = vrsqrt.f32 %v2360_v53  ;;  %vm2380_vm13 = vmor %vm2378_vm12, %vm2379_vm11  ;;  %vm2388_vm15 = vweird.f32 %v2360_v53 }
 0x7ff   :  { %v2416_v21 = vadd.f32 %v2670_v39, %v2409_v18  ;;  %v2374_v14 = vmul.f32 %v2812_v58, %v2373_v46 }
 0x801   :  { %2420 = vst.msk [vmem:[#allocation8] sm:$0xff] %vm116_vm0, %v2416_v21  ;;  %v2375_v16 = vmul.f32 0.5, %v2374_v14 }
 0x803   :  { %v2376_v20 = vsub.f32 1.5, %v2375_v16 }
 0x804   :  { %v2814_v41 = vpop.eup %2813 }
 0x805   :  { %v2377_v25 = vmul.f32 %v2812_v58, %v2376_v20  ;;  %v2383_v11 = vmul.f32 %v2814_v41, %v2360_v53  ;;  %vm2389_vm14 = vweird.f32 %v2814_v41 }
 0x806   :  { %vm2390_vm1 = vmor %vm2388_vm15, %vm2389_vm14 }
 0x807   :  { %v2381_v48 = vsel %vm2380_vm13, %v2812_v58, %v2377_v25  ;;  %v2384_v8 = vmul.f32 %v2814_v41, %v2383_v11 }
 0x808   :  { %v2403_v30 = vmul.f32 %v2381_v48, %v2335_v22 }
 0x809   :  { %v2385_v13 = vmul.f32 0.5, %v2384_v8 }
 0x80a   :  { %v2410_v59 = vmul.f32 %v2669_v57, %v2403_v30 }
 0x80b   :  { %v2386_v33 = vsub.f32 1.5, %v2385_v13 }
 0x80c   :  { %v2417_v32 = vadd.f32 %v2670_v39, %v2410_v59 }
 0x80d   :  { %v2387_v19 = vmul.f32 %v2814_v41, %v2386_v33 }
 0x80e   :  { %2421 = vst.msk [vmem:[#allocation8 + $0x8] sm:$0xff] %vm116_vm0, %v2417_v32 }
 0x80f   :  { %v2391_v27 = vsel %vm2390_vm1, %v2814_v41, %v2387_v19 }
 0x810   :  { %v2404_v28 = vmul.f32 %v2391_v27, %v4179_v40 }
 0x812   :  { %v2411_v2 = vmul.f32 %v2669_v57, %v2404_v28 }
 0x814   :  { %v2418_v43 = vadd.f32 %v2670_v39, %v2411_v2 }
 0x816   :  { %2422 = vst.msk [vmem:[#allocation8 + $0x10] sm:$0xff] %vm116_vm0, %v2418_v43 }
 0x827   :  { %v2353_v37 = vpop.xlane.xlu0 %2352 }
 0x828   :  { %v2357_v26 = vmul.f32 %v2353_v37, %v3940_v50 }
 0x82a   :  { %v2361_v42 = vadd.f32 1e-05, %v2357_v26 }
 0x82c   :  { %2815 = vrsqrt.f32 %v2361_v42  ;;  %vm2398_vm3 = vweird.f32 %v2361_v42 }
 0x832   :  { %v2816_v3 = vpop.eup %2815 }
 0x833   :  { %v2393_v31 = vmul.f32 %v2816_v3, %v2361_v42  ;;  %vm2399_vm2 = vweird.f32 %v2816_v3 }
 0x834   :  { %vm2400_vm4 = vmor %vm2398_vm3, %vm2399_vm2 }
 0x835   :  { %v2394_v49 = vmul.f32 %v2816_v3, %v2393_v31 }
 0x837   :  { %v2395_v35 = vmul.f32 0.5, %v2394_v49 }
 0x839   :  { %v2396_v29 = vsub.f32 1.5, %v2395_v35 }
 0x83b   :  { %v2397_v36 = vmul.f32 %v2816_v3, %v2396_v29 }
 0x83d   :  { %v2401_v22 = vsel %vm2400_vm4, %v2816_v3, %v2397_v36 }
 0x83e   :  { %v2405_v45 = vmul.f32 %v2401_v22, %v4185_v47 }
 0x840   :  { %v2412_v50 = vmul.f32 %v2669_v57, %v2405_v45 }
 0x842   :  { %v2419_v52 = vadd.f32 %v2670_v39, %v2412_v50 }
 0x844   :  { %2423 = vst.msk [vmem:[#allocation8 + $0x18] sm:$0xff] %vm116_vm0, %v2419_v52 }
 0x845   :  { %2436 = dma.vmem_to_hbm [thread:$0]  %s2429_s16, 512, %s2431_s24, [#allocation4], %s2925_s20, %s2925_s20, %s2926_s21  }
 0x846   :  { %2921 = dma.done.wait [#allocation4], 512  }
 0x847   :  { %2922 = vsyncadd [#allocation4], 4294966784 }
 0x848   :  { %2441 = vsyncpa [#allocation3], 1 }
 0x849   :  { %2442 = vsyncpa [#allocation6], 1 }
 0x84a   :  { %2443 = vsyncpa [#allocation4], 1 }

</bundles_post_ra>
